<compile_context>
chip_gen: v5e
topology: v5e:2x2
jax: 0.10.0
libtpu: 0.0.40
codegen_flags: <defaults>
</compile_context>

<pallas_src>
import functools
import math

import jax
import jax.numpy as jnp
from jax import lax
from jax.experimental import pallas as pl
from jax.experimental.pallas import tpu as pltpu


_LN_EPS = 1e-6  # matches the from-scratch LayerNormalization used by SkipConnection


def _layernorm(x, gamma, beta):
    mean = jnp.mean(x, axis=-1, keepdims=True)
    var = jnp.mean((x - mean) ** 2, axis=-1, keepdims=True)
    return (x - mean) * lax.rsqrt(var + _LN_EPS) * gamma + beta


def encoder_block_kernel(x_ref, mask_ref,
                         wq_ref, bq_ref, wk_ref, bk_ref, wv_ref, bv_ref,
                         wo_ref, bo_ref, gamma_ref, beta_ref,
                         w1_ref, b1_ref, w2_ref, b2_ref,
                         o_ref,
                         hx_s, bias_s, acc_s):
    h_idx = pl.program_id(1)

    # ---- head 0 of each batch: cache LN(x), additive mask bias, zero the accum ----
    @pl.when(h_idx == 0)
    def _init():
        x = x_ref[...]                                           # (S, D) f32
        hx_s[...] = _layernorm(x, gamma_ref[...], beta_ref[...]).astype(jnp.bfloat16)
        bias_s[...] = jnp.where(mask_ref[...] == 0.0,
                                jnp.float32(-1e9), jnp.float32(0.0))
        acc_s[...] = jnp.zeros_like(acc_s)

    hx = hx_s[...]                                               # (S, D) bf16

    # per-head projections (weights already sliced per head, bf16, f32 accum);
    # the 1/sqrt(dk) scale is pre-folded into wq/bq host-side.
    q = jnp.dot(hx, wq_ref[...], preferred_element_type=jnp.float32) + bq_ref[...]
    k = jnp.dot(hx, wk_ref[...], preferred_element_type=jnp.float32) + bk_ref[...]
    v = jnp.dot(hx, wv_ref[...], preferred_element_type=jnp.float32) + bv_ref[...]

    # scores = q @ k^T : contract the last dims directly (no explicit transpose)
    scores = lax.dot_general(q.astype(jnp.bfloat16), k.astype(jnp.bfloat16),
                             dimension_numbers=(((1,), (1,)), ((), ())),
                             preferred_element_type=jnp.float32)   # (S, S) f32
    scores = scores + bias_s[...]                                  # masked_fill == -1e9

    m = jnp.max(scores, axis=-1, keepdims=True)
    p = jnp.exp(scores - m)
    denom = jnp.sum(p, axis=-1, keepdims=True)
    p = p * pl.reciprocal(denom, approx=True)        # EUP slot instead of VALU divide

    ctx = jnp.dot(p.astype(jnp.bfloat16), v.astype(jnp.bfloat16),
                  preferred_element_type=jnp.float32)              # (S, dk)
    # fold the output projection into a per-head accumulation (no concat)
    acc_s[...] += jnp.dot(ctx.astype(jnp.bfloat16), wo_ref[...],
                          preferred_element_type=jnp.float32)      # (S, D)

    # ---- last head: attention residual + feed-forward sublayer + residual ----
    @pl.when(h_idx == pl.num_programs(1) - 1)
    def _finish():
        x = x_ref[...]
        # TODO(synk): dropout has no Pallas-side RNG wired here; identity (eval mode).
        x1 = x + acc_s[...] + bo_ref[...]
        h2 = _layernorm(x1, gamma_ref[...], beta_ref[...]).astype(jnp.bfloat16)
        ff = jnp.dot(h2, w1_ref[...], preferred_element_type=jnp.float32) + b1_ref[...]
        ff = jnp.maximum(ff, 0.0).astype(jnp.bfloat16)             # ReLU
        ff = jnp.dot(ff, w2_ref[...], preferred_element_type=jnp.float32) + b2_ref[...]
        o_ref[...] = (x1 + ff).astype(o_ref.dtype)


def encoder_block(x, src_mask, params, num_heads):
    B, S, D = x.shape
    H = num_heads
    assert D % H == 0
    dk = D // H
    dff = params["w1"].shape[1]
    scale = 1.0 / math.sqrt(dk)

    # ---- host-side (XLA) weight re-layout + bf16 cast for the MXU operands ----
    def per_head_w(w, s=1.0):   # (D, D) -> (H, D, dk)
        return (w * s).reshape(D, H, dk).transpose(1, 0, 2).astype(jnp.bfloat16)

    def per_head_b(b, s=1.0):   # (1, D) -> (H, 1, dk)
        return (b * s).reshape(H, dk)[:, None, :].astype(jnp.float32)

    wq, bq = per_head_w(params["wq"], scale), per_head_b(params["bq"], scale)
    wk, bk = per_head_w(params["wk"]), per_head_b(params["bk"])
    wv, bv = per_head_w(params["wv"]), per_head_b(params["bv"])
    wo = params["wo"].reshape(H, dk, D).astype(jnp.bfloat16)   # rows grouped by head
    w1 = params["w1"].astype(jnp.bfloat16)
    w2 = params["w2"].astype(jnp.bfloat16)

    def head_spec(shape):     # streamed per head: block index follows grid axis 1
        return pl.BlockSpec((None,) + shape, lambda b, h: (h,) + (0,) * len(shape))

    def fixed(shape):         # resident: constant block index -> fetched once
        return pl.BlockSpec(shape, lambda b, h: (0,) * len(shape))

    in_specs = [
        pl.BlockSpec((None, S, D), lambda b, h: (b, 0, 0)),    # x       (per batch)
        pl.BlockSpec((None, S, S), lambda b, h: (b, 0, 0)),    # src_mask(per batch)
        head_spec((D, dk)), head_spec((1, dk)),                # wq, bq (scale folded)
        head_spec((D, dk)), head_spec((1, dk)),                # wk, bk
        head_spec((D, dk)), head_spec((1, dk)),                # wv, bv
        head_spec((dk, D)),                                    # wo (per-head rows)
        fixed((1, D)),                                         # bo
        fixed((1, D)), fixed((1, D)),                          # gamma, beta
        fixed((D, dff)), fixed((1, dff)),                      # w1, b1
        fixed((dff, D)), fixed((1, D)),                        # w2, b2
    ]

    return pl.pallas_call(
        encoder_block_kernel,
        out_shape=jax.ShapeDtypeStruct((B, S, D), x.dtype),
        grid=(B, H),
        in_specs=in_specs,
        out_specs=pl.BlockSpec((None, S, D), lambda b, h: (b, 0, 0)),
        scratch_shapes=[
            pltpu.VMEM((S, D), jnp.bfloat16),   # cached LN(x)
            pltpu.VMEM((S, S), jnp.float32),    # cached additive mask bias
            pltpu.VMEM((S, D), jnp.float32),    # attention-output accumulator
        ],
        compiler_params=pltpu.CompilerParams(
            dimension_semantics=("parallel", "arbitrary"),
            # explicit scoped-VMEM budget: footprint here is well under this, and
            # bf16 weights keep it small even at larger D/dff (v7x has 64 MiB).
            vmem_limit_bytes=32 * 1024 * 1024,
        ),
    )(x, src_mask, wq, bq, wk, bk, wv, bv, wo,
      params["bo"], params["gamma"], params["beta"],
      w1, params["b1"], w2, params["b2"])


def init_params(key, d_model, d_ff):
    keys = jax.random.split(key, 8)

    def lin(k, fan_in, fan_out):
        return (jax.random.normal(k, (fan_in, fan_out), jnp.float32)
                / math.sqrt(fan_in))

    return {
        "wq": lin(keys[0], d_model, d_model), "bq": jnp.zeros((1, d_model), jnp.float32),
        "wk": lin(keys[1], d_model, d_model), "bk": jnp.zeros((1, d_model), jnp.float32),
        "wv": lin(keys[2], d_model, d_model), "bv": jnp.zeros((1, d_model), jnp.float32),
        "wo": lin(keys[3], d_model, d_model), "bo": jnp.zeros((1, d_model), jnp.float32),
        "gamma": jnp.ones((1, d_model), jnp.float32),
        "beta": jnp.zeros((1, d_model), jnp.float32),
        "w1": lin(keys[4], d_model, d_ff), "b1": 0.01 * jnp.ones((1, d_ff), jnp.float32),
        "w2": lin(keys[5], d_ff, d_model), "b2": 0.01 * jnp.ones((1, d_model), jnp.float32),
    }


def reference_forward(x, src_mask, params, num_heads):
    """Pure-JAX f32 reference of the EncoderBlock forward (for a tolerance check)."""
    B, S, D = x.shape
    dk = D // num_heads

    def ln(t):
        mu = jnp.mean(t, axis=-1, keepdims=True)
        var = jnp.mean((t - mu) ** 2, axis=-1, keepdims=True)
        return (t - mu) / jnp.sqrt(var + _LN_EPS) * params["gamma"] + params["beta"]

    h = ln(x)
    q = h @ params["wq"] + params["bq"]
    k = h @ params["wk"] + params["bk"]
    v = h @ params["wv"] + params["bv"]

    def split(t):
        return t.reshape(B, S, num_heads, dk).transpose(0, 2, 1, 3)

    q, k, v = split(q), split(k), split(v)
    s = jnp.einsum("bhqd,bhkd->bhqk", q, k) / math.sqrt(dk)
    s = jnp.where(src_mask[:, None, :, :] == 0.0, -1e9, s)
    a = jax.nn.softmax(s, axis=-1)
    ctx = jnp.einsum("bhqk,bhkd->bhqd", a, v).transpose(0, 2, 1, 3).reshape(B, S, D)
    attn = ctx @ params["wo"] + params["bo"]
    x1 = x + attn
    h2 = ln(x1)
    ff = jnp.maximum(h2 @ params["w1"] + params["b1"], 0.0)
    ff = ff @ params["w2"] + params["b2"]
    return x1 + ff


if __name__ == "__main__":
    B, S, D, H, DFF = 2, 32, 128, 4, 256

    key = jax.random.PRNGKey(0)
    kx, kp = jax.random.split(key)
    x = jax.random.normal(kx, (B, S, D), jnp.float32)

    # Padding-style source mask: batch 0 attends to all tokens, batch 1 to S-5.
    lengths = jnp.array([S, S - 5], jnp.int32)
    key_mask = (jnp.arange(S)[None, :] < lengths[:, None]).astype(jnp.float32)  # (B, S)
    src_mask = jnp.broadcast_to(key_mask[:, None, :], (B, S, S))                # (B, S, S)

    params = init_params(kp, D, DFF)

    run = jax.jit(functools.partial(encoder_block, num_heads=H))
    out = jax.block_until_ready(run(x, src_mask, params))
    ref = jax.block_until_ready(reference_forward(x, src_mask, params, H))

    assert out.shape == (B, S, D)
    assert bool(jnp.all(jnp.isfinite(out)))
    err = float(jnp.max(jnp.abs(out - ref)))
    assert err < 3e-1, f"max abs error vs f32 reference too large: {err}"
    print("KERNEL_OK")
</pallas_src>

<mosaic_0001>
module attributes {stable_mosaic.version = 11 : i64} {
  func.func @encoder_block_kernel(%arg0: i32, %arg1: i32, %arg2: memref<1x32x128xf32, #tpu.memory_space<vmem>>, %arg3: memref<1x32x32xf32, #tpu.memory_space<vmem>>, %arg4: memref<1x128x32xbf16, #tpu.memory_space<vmem>>, %arg5: memref<1x1x32xf32, #tpu.memory_space<vmem>>, %arg6: memref<1x128x32xbf16, #tpu.memory_space<vmem>>, %arg7: memref<1x1x32xf32, #tpu.memory_space<vmem>>, %arg8: memref<1x128x32xbf16, #tpu.memory_space<vmem>>, %arg9: memref<1x1x32xf32, #tpu.memory_space<vmem>>, %arg10: memref<1x32x128xbf16, #tpu.memory_space<vmem>>, %arg11: memref<1x128xf32, #tpu.memory_space<vmem>>, %arg12: memref<1x128xf32, #tpu.memory_space<vmem>>, %arg13: memref<1x128xf32, #tpu.memory_space<vmem>>, %arg14: memref<128x256xbf16, #tpu.memory_space<vmem>>, %arg15: memref<1x256xf32, #tpu.memory_space<vmem>>, %arg16: memref<256x128xbf16, #tpu.memory_space<vmem>>, %arg17: memref<1x128xf32, #tpu.memory_space<vmem>>, %arg18: memref<1x32x128xf32, #tpu.memory_space<vmem>>, %arg19: memref<32x128xbf16, #tpu.memory_space<vmem>>, %arg20: memref<32x32xf32, #tpu.memory_space<vmem>>, %arg21: memref<32x128xf32, #tpu.memory_space<vmem>>) attributes {dimension_semantics = [#tpu.dimension_semantics<parallel>, #tpu.dimension_semantics<arbitrary>], iteration_bounds = array<i64: 2, 4>, scalar_prefetch = 0 : i64, scratch_operands = 3 : i64, tpu.core_type = #tpu.core_type<tc>, window_params = [{transform_indices = @transform_0, window_bounds = array<i64: 1, 32, 128>}, {transform_indices = @transform_1, window_bounds = array<i64: 1, 32, 32>}, {transform_indices = @transform_2, window_bounds = array<i64: 1, 128, 32>}, {transform_indices = @transform_3, window_bounds = array<i64: 1, 1, 32>}, {transform_indices = @transform_4, window_bounds = array<i64: 1, 128, 32>}, {transform_indices = @transform_5, window_bounds = array<i64: 1, 1, 32>}, {transform_indices = @transform_6, window_bounds = array<i64: 1, 128, 32>}, {transform_indices = @transform_7, window_bounds = array<i64: 1, 1, 32>}, {transform_indices = @transform_8, window_bounds = array<i64: 1, 32, 128>}, {pipeline_mode = #tpu.pipeline_mode<synchronous>, transform_indices = @transform_9, window_bounds = array<i64: 1, 128>}, {pipeline_mode = #tpu.pipeline_mode<synchronous>, transform_indices = @transform_10, window_bounds = array<i64: 1, 128>}, {pipeline_mode = #tpu.pipeline_mode<synchronous>, transform_indices = @transform_11, window_bounds = array<i64: 1, 128>}, {pipeline_mode = #tpu.pipeline_mode<synchronous>, transform_indices = @transform_12, window_bounds = array<i64: 128, 256>}, {pipeline_mode = #tpu.pipeline_mode<synchronous>, transform_indices = @transform_13, window_bounds = array<i64: 1, 256>}, {pipeline_mode = #tpu.pipeline_mode<synchronous>, transform_indices = @transform_14, window_bounds = array<i64: 256, 128>}, {pipeline_mode = #tpu.pipeline_mode<synchronous>, transform_indices = @transform_15, window_bounds = array<i64: 1, 128>}, {transform_indices = @transform_16, window_bounds = array<i64: 1, 32, 128>}]} {
    %c0_i32 = arith.constant 0 : i32
    %0 = arith.cmpi eq, %arg1, %c0_i32 : i32
    %1 = arith.extui %0 : i1 to i32
    %c0_i32_0 = arith.constant 0 : i32
    %2 = arith.cmpi ne, %1, %c0_i32_0 : i32
    scf.if %2 {
      %c0_37 = arith.constant 0 : index
      %c0_38 = arith.constant 0 : index
      %c0_39 = arith.constant 0 : index
      %53 = vector.load %arg2[%c0_37, %c0_38, %c0_39] : memref<1x32x128xf32, #tpu.memory_space<vmem>>, vector<1x32x128xf32>
      %54 = vector.shape_cast %53 : vector<1x32x128xf32> to vector<32x128xf32>
      %c0_40 = arith.constant 0 : index
      %c0_41 = arith.constant 0 : index
      %55 = vector.load %arg12[%c0_40, %c0_41] : memref<1x128xf32, #tpu.memory_space<vmem>>, vector<1x128xf32>
      %c0_42 = arith.constant 0 : index
      %c0_43 = arith.constant 0 : index
      %56 = vector.load %arg13[%c0_42, %c0_43] : memref<1x128xf32, #tpu.memory_space<vmem>>, vector<1x128xf32>
      %cst_44 = arith.constant dense<0.000000e+00> : vector<32xf32>
      %57 = vector.multi_reduction <add>, %54, %cst_44 [1] : vector<32x128xf32> to vector<32xf32>
      %58 = vector.shape_cast %57 : vector<32xf32> to vector<32x1xf32>
      %cst_45 = arith.constant 1.280000e+02 : f32
      %59 = vector.broadcast %cst_45 : f32 to vector<32x1xf32>
      %60 = arith.divf %58, %59 : vector<32x1xf32>
      %61 = vector.broadcast %60 : vector<32x1xf32> to vector<32x128xf32>
      %62 = arith.subf %54, %61 : vector<32x128xf32>
      %63 = arith.mulf %62, %62 : vector<32x128xf32>
      %cst_46 = arith.constant dense<0.000000e+00> : vector<32xf32>
      %64 = vector.multi_reduction <add>, %63, %cst_46 [1] : vector<32x128xf32> to vector<32xf32>
      %65 = vector.shape_cast %64 : vector<32xf32> to vector<32x1xf32>
      %cst_47 = arith.constant 1.280000e+02 : f32
      %66 = vector.broadcast %cst_47 : f32 to vector<32x1xf32>
      %67 = arith.divf %65, %66 : vector<32x1xf32>
      %68 = vector.broadcast %60 : vector<32x1xf32> to vector<32x128xf32>
      %69 = arith.subf %54, %68 : vector<32x128xf32>
      %cst_48 = arith.constant 9.99999997E-7 : f32
      %70 = vector.broadcast %cst_48 : f32 to vector<32x1xf32>
      %71 = arith.addf %67, %70 : vector<32x1xf32>
      %72 = math.rsqrt %71 : vector<32x1xf32>
      %73 = vector.broadcast %72 : vector<32x1xf32> to vector<32x128xf32>
      %74 = arith.mulf %69, %73 : vector<32x128xf32>
      %75 = vector.broadcast %55 : vector<1x128xf32> to vector<32x128xf32>
      %76 = arith.mulf %74, %75 : vector<32x128xf32>
      %77 = vector.broadcast %56 : vector<1x128xf32> to vector<32x128xf32>
      %78 = arith.addf %76, %77 : vector<32x128xf32>
      %79 = arith.truncf %78 : vector<32x128xf32> to vector<32x128xbf16>
      %c0_49 = arith.constant 0 : index
      %c0_50 = arith.constant 0 : index
      %80 = vector.load %arg19[%c0_49, %c0_50] : memref<32x128xbf16, #tpu.memory_space<vmem>>, vector<32x128xbf16>
      tpu.vector_store %arg19[%c0_49, %c0_50], %79 {strides = array<i32>} : memref<32x128xbf16, #tpu.memory_space<vmem>>, vector<32x128xbf16>,
      %c0_51 = arith.constant 0 : index
      %c0_52 = arith.constant 0 : index
      %c0_53 = arith.constant 0 : index
      %81 = vector.load %arg3[%c0_51, %c0_52, %c0_53] : memref<1x32x32xf32, #tpu.memory_space<vmem>>, vector<1x32x32xf32>
      %82 = vector.shape_cast %81 : vector<1x32x32xf32> to vector<32x32xf32>
      %cst_54 = arith.constant 0.000000e+00 : f32
      %83 = vector.broadcast %cst_54 : f32 to vector<32x32xf32>
      %84 = arith.cmpf oeq, %82, %83 : vector<32x32xf32>
      %cst_55 = arith.constant -1.000000e+09 : f32
      %cst_56 = arith.constant 0.000000e+00 : f32
      %85 = vector.broadcast %cst_55 : f32 to vector<32x32xf32>
      %86 = vector.broadcast %cst_56 : f32 to vector<32x32xf32>
      %87 = arith.select %84, %85, %86 : vector<32x32xi1>, vector<32x32xf32>
      %c0_57 = arith.constant 0 : index
      %c0_58 = arith.constant 0 : index
      %88 = vector.load %arg20[%c0_57, %c0_58] : memref<32x32xf32, #tpu.memory_space<vmem>>, vector<32x32xf32>
      tpu.vector_store %arg20[%c0_57, %c0_58], %87 {strides = array<i32>} : memref<32x32xf32, #tpu.memory_space<vmem>>, vector<32x32xf32>,
      %cst_59 = arith.constant 0.000000e+00 : f32
      %89 = vector.broadcast %cst_59 : f32 to vector<32x128xf32>
      %c0_60 = arith.constant 0 : index
      %c0_61 = arith.constant 0 : index
      %90 = vector.load %arg21[%c0_60, %c0_61] : memref<32x128xf32, #tpu.memory_space<vmem>>, vector<32x128xf32>
      tpu.vector_store %arg21[%c0_60, %c0_61], %89 {strides = array<i32>} : memref<32x128xf32, #tpu.memory_space<vmem>>, vector<32x128xf32>,
    } else {
    }
    %c0 = arith.constant 0 : index
    %c0_1 = arith.constant 0 : index
    %3 = vector.load %arg19[%c0, %c0_1] : memref<32x128xbf16, #tpu.memory_space<vmem>>, vector<32x128xbf16>
    %c0_2 = arith.constant 0 : index
    %c0_3 = arith.constant 0 : index
    %c0_4 = arith.constant 0 : index
    %4 = vector.load %arg4[%c0_2, %c0_3, %c0_4] : memref<1x128x32xbf16, #tpu.memory_space<vmem>>, vector<1x128x32xbf16>
    %5 = vector.shape_cast %4 : vector<1x128x32xbf16> to vector<128x32xbf16>
    %cst = arith.constant dense<0.000000e+00> : vector<32x32xf32>
    %6 = tpu.matmul %3, %5, %cst {dimension_numbers = #tpu.dot_dimension_numbers<[1], [0], [0], [1], [0, 0, 1, 1], [], []>} : vector<32x128xbf16>, vector<128x32xbf16>, vector<32x32xf32> -> vector<32x32xf32>
    %c0_5 = arith.constant 0 : index
    %c0_6 = arith.constant 0 : index
    %c0_7 = arith.constant 0 : index
    %7 = vector.load %arg5[%c0_5, %c0_6, %c0_7] : memref<1x1x32xf32, #tpu.memory_space<vmem>>, vector<1x1x32xf32>
    %8 = vector.shape_cast %7 : vector<1x1x32xf32> to vector<1x32xf32>
    %9 = vector.broadcast %8 : vector<1x32xf32> to vector<32x32xf32>
    %10 = arith.addf %6, %9 : vector<32x32xf32>
    %c0_8 = arith.constant 0 : index
    %c0_9 = arith.constant 0 : index
    %c0_10 = arith.constant 0 : index
    %11 = vector.load %arg6[%c0_8, %c0_9, %c0_10] : memref<1x128x32xbf16, #tpu.memory_space<vmem>>, vector<1x128x32xbf16>
    %12 = vector.shape_cast %11 : vector<1x128x32xbf16> to vector<128x32xbf16>
    %cst_11 = arith.constant dense<0.000000e+00> : vector<32x32xf32>
    %13 = tpu.matmul %3, %12, %cst_11 {dimension_numbers = #tpu.dot_dimension_numbers<[1], [0], [0], [1], [0, 0, 1, 1], [], []>} : vector<32x128xbf16>, vector<128x32xbf16>, vector<32x32xf32> -> vector<32x32xf32>
    %c0_12 = arith.constant 0 : index
    %c0_13 = arith.constant 0 : index
    %c0_14 = arith.constant 0 : index
    %14 = vector.load %arg7[%c0_12, %c0_13, %c0_14] : memref<1x1x32xf32, #tpu.memory_space<vmem>>, vector<1x1x32xf32>
    %15 = vector.shape_cast %14 : vector<1x1x32xf32> to vector<1x32xf32>
    %16 = vector.broadcast %15 : vector<1x32xf32> to vector<32x32xf32>
    %17 = arith.addf %13, %16 : vector<32x32xf32>
    %c0_15 = arith.constant 0 : index
    %c0_16 = arith.constant 0 : index
    %c0_17 = arith.constant 0 : index
    %18 = vector.load %arg8[%c0_15, %c0_16, %c0_17] : memref<1x128x32xbf16, #tpu.memory_space<vmem>>, vector<1x128x32xbf16>
    %19 = vector.shape_cast %18 : vector<1x128x32xbf16> to vector<128x32xbf16>
    %cst_18 = arith.constant dense<0.000000e+00> : vector<32x32xf32>
    %20 = tpu.matmul %3, %19, %cst_18 {dimension_numbers = #tpu.dot_dimension_numbers<[1], [0], [0], [1], [0, 0, 1, 1], [], []>} : vector<32x128xbf16>, vector<128x32xbf16>, vector<32x32xf32> -> vector<32x32xf32>
    %c0_19 = arith.constant 0 : index
    %c0_20 = arith.constant 0 : index
    %c0_21 = arith.constant 0 : index
    %21 = vector.load %arg9[%c0_19, %c0_20, %c0_21] : memref<1x1x32xf32, #tpu.memory_space<vmem>>, vector<1x1x32xf32>
    %22 = vector.shape_cast %21 : vector<1x1x32xf32> to vector<1x32xf32>
    %23 = vector.broadcast %22 : vector<1x32xf32> to vector<32x32xf32>
    %24 = arith.addf %20, %23 : vector<32x32xf32>
    %25 = arith.truncf %10 : vector<32x32xf32> to vector<32x32xbf16>
    %26 = arith.truncf %17 : vector<32x32xf32> to vector<32x32xbf16>
    %cst_22 = arith.constant dense<0.000000e+00> : vector<32x32xf32>
    %27 = tpu.matmul %25, %26, %cst_22 {dimension_numbers = #tpu.dot_dimension_numbers<[1], [1], [0], [0], [0, 0, 1, 0], [], []>} : vector<32x32xbf16>, vector<32x32xbf16>, vector<32x32xf32> -> vector<32x32xf32>
    %c0_23 = arith.constant 0 : index
    %c0_24 = arith.constant 0 : index
    %28 = vector.load %arg20[%c0_23, %c0_24] : memref<32x32xf32, #tpu.memory_space<vmem>>, vector<32x32xf32>
    %29 = arith.addf %27, %28 : vector<32x32xf32>
    %cst_25 = arith.constant dense<0xFF800000> : vector<32xf32>
    %30 = vector.multi_reduction <maximumf>, %29, %cst_25 [1] : vector<32x32xf32> to vector<32xf32>
    %31 = vector.shape_cast %30 : vector<32xf32> to vector<32x1xf32>
    %32 = vector.broadcast %31 : vector<32x1xf32> to vector<32x32xf32>
    %33 = arith.subf %29, %32 : vector<32x32xf32>
    %34 = math.exp %33 : vector<32x32xf32>
    %cst_26 = arith.constant dense<0.000000e+00> : vector<32xf32>
    %35 = vector.multi_reduction <add>, %34, %cst_26 [1] : vector<32x32xf32> to vector<32xf32>
    %36 = vector.shape_cast %35 : vector<32xf32> to vector<32x1xf32>
    %37 = tpu.reciprocal %36 {approx = true} : vector<32x1xf32> -> vector<32x1xf32>
    %38 = vector.broadcast %37 : vector<32x1xf32> to vector<32x32xf32>
    %39 = arith.mulf %34, %38 : vector<32x32xf32>
    %40 = arith.truncf %39 : vector<32x32xf32> to vector<32x32xbf16>
    %41 = arith.truncf %24 : vector<32x32xf32> to vector<32x32xbf16>
    %cst_27 = arith.constant dense<0.000000e+00> : vector<32x32xf32>
    %42 = tpu.matmul %40, %41, %cst_27 {dimension_numbers = #tpu.dot_dimension_numbers<[1], [0], [0], [1], [0, 0, 1, 1], [], []>} : vector<32x32xbf16>, vector<32x32xbf16>, vector<32x32xf32> -> vector<32x32xf32>
    %c0_28 = arith.constant 0 : index
    %c0_29 = arith.constant 0 : index
    %43 = vector.load %arg21[%c0_28, %c0_29] : memref<32x128xf32, #tpu.memory_space<vmem>>, vector<32x128xf32>
    %44 = arith.truncf %42 : vector<32x32xf32> to vector<32x32xbf16>
    %c0_30 = arith.constant 0 : index
    %c0_31 = arith.constant 0 : index
    %c0_32 = arith.constant 0 : index
    %45 = vector.load %arg10[%c0_30, %c0_31, %c0_32] : memref<1x32x128xbf16, #tpu.memory_space<vmem>>, vector<1x32x128xbf16>
    %46 = vector.shape_cast %45 : vector<1x32x128xbf16> to vector<32x128xbf16>
    %cst_33 = arith.constant dense<0.000000e+00> : vector<32x128xf32>
    %47 = tpu.matmul %44, %46, %cst_33 {dimension_numbers = #tpu.dot_dimension_numbers<[1], [0], [0], [1], [0, 0, 1, 1], [], []>} : vector<32x32xbf16>, vector<32x128xbf16>, vector<32x128xf32> -> vector<32x128xf32>
    %48 = arith.addf %43, %47 : vector<32x128xf32>
    %c0_34 = arith.constant 0 : index
    %c0_35 = arith.constant 0 : index
    %49 = vector.load %arg21[%c0_34, %c0_35] : memref<32x128xf32, #tpu.memory_space<vmem>>, vector<32x128xf32>
    tpu.vector_store %arg21[%c0_34, %c0_35], %48 {strides = array<i32>} : memref<32x128xf32, #tpu.memory_space<vmem>>, vector<32x128xf32>,
    %c3_i32 = arith.constant 3 : i32
    %50 = arith.cmpi eq, %arg1, %c3_i32 : i32
    %51 = arith.extui %50 : i1 to i32
    %c0_i32_36 = arith.constant 0 : i32
    %52 = arith.cmpi ne, %51, %c0_i32_36 : i32
    scf.if %52 {
      %c0_37 = arith.constant 0 : index
      %c0_38 = arith.constant 0 : index
      %c0_39 = arith.constant 0 : index
      %53 = vector.load %arg2[%c0_37, %c0_38, %c0_39] : memref<1x32x128xf32, #tpu.memory_space<vmem>>, vector<1x32x128xf32>
      %54 = vector.shape_cast %53 : vector<1x32x128xf32> to vector<32x128xf32>
      %c0_40 = arith.constant 0 : index
      %c0_41 = arith.constant 0 : index
      %55 = vector.load %arg21[%c0_40, %c0_41] : memref<32x128xf32, #tpu.memory_space<vmem>>, vector<32x128xf32>
      %56 = arith.addf %54, %55 : vector<32x128xf32>
      %c0_42 = arith.constant 0 : index
      %c0_43 = arith.constant 0 : index
      %57 = vector.load %arg11[%c0_42, %c0_43] : memref<1x128xf32, #tpu.memory_space<vmem>>, vector<1x128xf32>
      %58 = vector.broadcast %57 : vector<1x128xf32> to vector<32x128xf32>
      %59 = arith.addf %56, %58 : vector<32x128xf32>
      %c0_44 = arith.constant 0 : index
      %c0_45 = arith.constant 0 : index
      %60 = vector.load %arg12[%c0_44, %c0_45] : memref<1x128xf32, #tpu.memory_space<vmem>>, vector<1x128xf32>
      %c0_46 = arith.constant 0 : index
      %c0_47 = arith.constant 0 : index
      %61 = vector.load %arg13[%c0_46, %c0_47] : memref<1x128xf32, #tpu.memory_space<vmem>>, vector<1x128xf32>
      %cst_48 = arith.constant dense<0.000000e+00> : vector<32xf32>
      %62 = vector.multi_reduction <add>, %59, %cst_48 [1] : vector<32x128xf32> to vector<32xf32>
      %63 = vector.shape_cast %62 : vector<32xf32> to vector<32x1xf32>
      %cst_49 = arith.constant 1.280000e+02 : f32
      %64 = vector.broadcast %cst_49 : f32 to vector<32x1xf32>
      %65 = arith.divf %63, %64 : vector<32x1xf32>
      %66 = vector.broadcast %65 : vector<32x1xf32> to vector<32x128xf32>
      %67 = arith.subf %59, %66 : vector<32x128xf32>
      %68 = arith.mulf %67, %67 : vector<32x128xf32>
      %cst_50 = arith.constant dense<0.000000e+00> : vector<32xf32>
      %69 = vector.multi_reduction <add>, %68, %cst_50 [1] : vector<32x128xf32> to vector<32xf32>
      %70 = vector.shape_cast %69 : vector<32xf32> to vector<32x1xf32>
      %cst_51 = arith.constant 1.280000e+02 : f32
      %71 = vector.broadcast %cst_51 : f32 to vector<32x1xf32>
      %72 = arith.divf %70, %71 : vector<32x1xf32>
      %73 = vector.broadcast %65 : vector<32x1xf32> to vector<32x128xf32>
      %74 = arith.subf %59, %73 : vector<32x128xf32>
      %cst_52 = arith.constant 9.99999997E-7 : f32
      %75 = vector.broadcast %cst_52 : f32 to vector<32x1xf32>
      %76 = arith.addf %72, %75 : vector<32x1xf32>
      %77 = math.rsqrt %76 : vector<32x1xf32>
      %78 = vector.broadcast %77 : vector<32x1xf32> to vector<32x128xf32>
      %79 = arith.mulf %74, %78 : vector<32x128xf32>
      %80 = vector.broadcast %60 : vector<1x128xf32> to vector<32x128xf32>
      %81 = arith.mulf %79, %80 : vector<32x128xf32>
      %82 = vector.broadcast %61 : vector<1x128xf32> to vector<32x128xf32>
      %83 = arith.addf %81, %82 : vector<32x128xf32>
      %84 = arith.truncf %83 : vector<32x128xf32> to vector<32x128xbf16>
      %c0_53 = arith.constant 0 : index
      %c0_54 = arith.constant 0 : index
      %85 = vector.load %arg14[%c0_53, %c0_54] : memref<128x256xbf16, #tpu.memory_space<vmem>>, vector<128x256xbf16>
      %cst_55 = arith.constant dense<0.000000e+00> : vector<32x256xf32>
      %86 = tpu.matmul %84, %85, %cst_55 {dimension_numbers = #tpu.dot_dimension_numbers<[1], [0], [0], [1], [0, 0, 1, 1], [], []>} : vector<32x128xbf16>, vector<128x256xbf16>, vector<32x256xf32> -> vector<32x256xf32>
      %c0_56 = arith.constant 0 : index
      %c0_57 = arith.constant 0 : index
      %87 = vector.load %arg15[%c0_56, %c0_57] : memref<1x256xf32, #tpu.memory_space<vmem>>, vector<1x256xf32>
      %88 = vector.broadcast %87 : vector<1x256xf32> to vector<32x256xf32>
      %89 = arith.addf %86, %88 : vector<32x256xf32>
      %cst_58 = arith.constant 0.000000e+00 : f32
      %90 = vector.broadcast %cst_58 : f32 to vector<32x256xf32>
      %91 = arith.maximumf %89, %90 : vector<32x256xf32>
      %92 = arith.truncf %91 : vector<32x256xf32> to vector<32x256xbf16>
      %c0_59 = arith.constant 0 : index
      %c0_60 = arith.constant 0 : index
      %93 = vector.load %arg16[%c0_59, %c0_60] : memref<256x128xbf16, #tpu.memory_space<vmem>>, vector<256x128xbf16>
      %cst_61 = arith.constant dense<0.000000e+00> : vector<32x128xf32>
      %94 = tpu.matmul %92, %93, %cst_61 {dimension_numbers = #tpu.dot_dimension_numbers<[1], [0], [0], [1], [0, 0, 1, 1], [], []>} : vector<32x256xbf16>, vector<256x128xbf16>, vector<32x128xf32> -> vector<32x128xf32>
      %c0_62 = arith.constant 0 : index
      %c0_63 = arith.constant 0 : index
      %95 = vector.load %arg17[%c0_62, %c0_63] : memref<1x128xf32, #tpu.memory_space<vmem>>, vector<1x128xf32>
      %96 = vector.broadcast %95 : vector<1x128xf32> to vector<32x128xf32>
      %97 = arith.addf %94, %96 : vector<32x128xf32>
      %98 = arith.addf %59, %97 : vector<32x128xf32>
      %c0_64 = arith.constant 0 : index
      %c0_65 = arith.constant 0 : index
      %c0_66 = arith.constant 0 : index
      %99 = vector.load %arg18[%c0_64, %c0_65, %c0_66] : memref<1x32x128xf32, #tpu.memory_space<vmem>>, vector<1x32x128xf32>
      %100 = vector.shape_cast %99 : vector<1x32x128xf32> to vector<32x128xf32>
      %101 = vector.shape_cast %98 : vector<32x128xf32> to vector<1x32x128xf32>
      tpu.vector_store %arg18[%c0_64, %c0_65, %c0_66], %101 {strides = array<i32>} : memref<1x32x128xf32, #tpu.memory_space<vmem>>, vector<1x32x128xf32>,
    } else {
    }
    return
  }
  func.func @transform_0(%arg0: i32, %arg1: i32) -> (i32, i32, i32) {
    %c0_i32 = arith.constant 0 : i32
    %c0_i32_0 = arith.constant 0 : i32
    %c0_i32_1 = arith.constant 0 : i32
    return %arg0, %c0_i32, %c0_i32_0 : i32, i32, i32
  }
  func.func @transform_1(%arg0: i32, %arg1: i32) -> (i32, i32, i32) {
    %c0_i32 = arith.constant 0 : i32
    %c0_i32_0 = arith.constant 0 : i32
    %c0_i32_1 = arith.constant 0 : i32
    return %arg0, %c0_i32, %c0_i32_0 : i32, i32, i32
  }
  func.func @transform_2(%arg0: i32, %arg1: i32) -> (i32, i32, i32) {
    %c0_i32 = arith.constant 0 : i32
    %c0_i32_0 = arith.constant 0 : i32
    %c0_i32_1 = arith.constant 0 : i32
    return %arg1, %c0_i32, %c0_i32_0 : i32, i32, i32
  }
  func.func @transform_3(%arg0: i32, %arg1: i32) -> (i32, i32, i32) {
    %c0_i32 = arith.constant 0 : i32
    %c0_i32_0 = arith.constant 0 : i32
    %c0_i32_1 = arith.constant 0 : i32
    return %arg1, %c0_i32, %c0_i32_0 : i32, i32, i32
  }
  func.func @transform_4(%arg0: i32, %arg1: i32) -> (i32, i32, i32) {
    %c0_i32 = arith.constant 0 : i32
    %c0_i32_0 = arith.constant 0 : i32
    %c0_i32_1 = arith.constant 0 : i32
    return %arg1, %c0_i32, %c0_i32_0 : i32, i32, i32
  }
  func.func @transform_5(%arg0: i32, %arg1: i32) -> (i32, i32, i32) {
    %c0_i32 = arith.constant 0 : i32
    %c0_i32_0 = arith.constant 0 : i32
    %c0_i32_1 = arith.constant 0 : i32
    return %arg1, %c0_i32, %c0_i32_0 : i32, i32, i32
  }
  func.func @transform_6(%arg0: i32, %arg1: i32) -> (i32, i32, i32) {
    %c0_i32 = arith.constant 0 : i32
    %c0_i32_0 = arith.constant 0 : i32
    %c0_i32_1 = arith.constant 0 : i32
    return %arg1, %c0_i32, %c0_i32_0 : i32, i32, i32
  }
  func.func @transform_7(%arg0: i32, %arg1: i32) -> (i32, i32, i32) {
    %c0_i32 = arith.constant 0 : i32
    %c0_i32_0 = arith.constant 0 : i32
    %c0_i32_1 = arith.constant 0 : i32
    return %arg1, %c0_i32, %c0_i32_0 : i32, i32, i32
  }
  func.func @transform_8(%arg0: i32, %arg1: i32) -> (i32, i32, i32) {
    %c0_i32 = arith.constant 0 : i32
    %c0_i32_0 = arith.constant 0 : i32
    %c0_i32_1 = arith.constant 0 : i32
    return %arg1, %c0_i32, %c0_i32_0 : i32, i32, i32
  }
  func.func @transform_9(%arg0: i32, %arg1: i32) -> (i32, i32) {
    %c0_i32 = arith.constant 0 : i32
    %c0_i32_0 = arith.constant 0 : i32
    %c0_i32_1 = arith.constant 0 : i32
    return %c0_i32, %c0_i32_0 : i32, i32
  }
  func.func @transform_10(%arg0: i32, %arg1: i32) -> (i32, i32) {
    %c0_i32 = arith.constant 0 : i32
    %c0_i32_0 = arith.constant 0 : i32
    %c0_i32_1 = arith.constant 0 : i32
    return %c0_i32, %c0_i32_0 : i32, i32
  }
  func.func @transform_11(%arg0: i32, %arg1: i32) -> (i32, i32) {
    %c0_i32 = arith.constant 0 : i32
    %c0_i32_0 = arith.constant 0 : i32
    %c0_i32_1 = arith.constant 0 : i32
    return %c0_i32, %c0_i32_0 : i32, i32
  }
  func.func @transform_12(%arg0: i32, %arg1: i32) -> (i32, i32) {
    %c0_i32 = arith.constant 0 : i32
    %c0_i32_0 = arith.constant 0 : i32
    %c0_i32_1 = arith.constant 0 : i32
    return %c0_i32, %c0_i32_0 : i32, i32
  }
  func.func @transform_13(%arg0: i32, %arg1: i32) -> (i32, i32) {
    %c0_i32 = arith.constant 0 : i32
    %c0_i32_0 = arith.constant 0 : i32
    %c0_i32_1 = arith.constant 0 : i32
    return %c0_i32, %c0_i32_0 : i32, i32
  }
  func.func @transform_14(%arg0: i32, %arg1: i32) -> (i32, i32) {
    %c0_i32 = arith.constant 0 : i32
    %c0_i32_0 = arith.constant 0 : i32
    %c0_i32_1 = arith.constant 0 : i32
    return %c0_i32, %c0_i32_0 : i32, i32
  }
  func.func @transform_15(%arg0: i32, %arg1: i32) -> (i32, i32) {
    %c0_i32 = arith.constant 0 : i32
    %c0_i32_0 = arith.constant 0 : i32
    %c0_i32_1 = arith.constant 0 : i32
    return %c0_i32, %c0_i32_0 : i32, i32
  }
  func.func @transform_16(%arg0: i32, %arg1: i32) -> (i32, i32, i32) {
    %c0_i32 = arith.constant 0 : i32
    %c0_i32_0 = arith.constant 0 : i32
    %c0_i32_1 = arith.constant 0 : i32
    return %arg0, %c0_i32, %c0_i32_0 : i32, i32, i32
  }
}

</mosaic_0001>

<bundles_post_ra>
// kernel: encoder_block.1
= control target key start
LH: loop header
LB: loop body
LE: loop exit
PB: predicated region body
PF: predicated region fallthrough
CT: control target
= control target key end

     0   :  { %s3065_s0 = inlined_call_operand.vmem [shape: f32[2,32,128], index: 0, kind: input, shape index: {}]   ;;  %s3066_s1 = inlined_call_operand.vmem [shape: f32[2,32,32], index: 1, kind: input, shape index: {}]   ;;  %s3067_s2 = inlined_call_operand.vmem [shape: bf16[4,128,32], index: 2, kind: input, shape index: {}]   ;;  %s3068_s3 = inlined_call_operand.vmem [shape: f32[4,1,32], index: 3, kind: input, shape index: {}]   ;;  %s3069_s4 = inlined_call_operand.vmem [shape: bf16[4,128,32], index: 4, kind: input, shape index: {}]   ;;  %s3070_s5 = inlined_call_operand.vmem [shape: f32[4,1,32], index: 5, kind: input, shape index: {}]   ;;  %s3071_s6 = inlined_call_operand.vmem [shape: bf16[4,128,32], index: 6, kind: input, shape index: {}]   ;;  %s3072_s7 = inlined_call_operand.vmem [shape: f32[4,1,32], index: 7, kind: input, shape index: {}]   ;;  %s3073_s8 = inlined_call_operand.vmem [shape: bf16[4,32,128], index: 8, kind: input, shape index: {}]   ;;  %s3074_s9 = inlined_call_operand.vmem [shape: f32[1,128], index: 9, kind: input, shape index: {}]   ;;  %s3075_s10 = inlined_call_operand.vmem [shape: f32[1,128], index: 10, kind: input, shape index: {}]   ;;  %s3076_s11 = inlined_call_operand.vmem [shape: f32[1,128], index: 11, kind: input, shape index: {}]   ;;  %s3077_s12 = inlined_call_operand.vmem [shape: bf16[128,256], index: 12, kind: input, shape index: {}]   ;;  %s3078_s13 = inlined_call_operand.vmem [shape: f32[1,256], index: 13, kind: input, shape index: {}]   ;;  %s3079_s14 = inlined_call_operand.vmem [shape: bf16[256,128], index: 14, kind: input, shape index: {}]   ;;  %s3080_s15 = inlined_call_operand.vmem [shape: f32[1,128], index: 15, kind: input, shape index: {}]   ;;  %s3081_s16 = inlined_call_operand.hbm [shape: f32[2,32,128], index: 16, kind: output, shape index: {}]  }
   0x1   :  { %3098 = sst [smem:[#allocation20_spill]] %s3065_s0 }
   0x2   :  { %3099 = sst [smem:[#allocation21_spill]] %s3066_s1 }
   0x3   :  { %3100 = sst [smem:[#allocation22_spill]] %s3067_s2 }
   0x4   :  { %3101 = sst [smem:[#allocation23_spill]] %s3077_s12 }
   0x5   :  { %3102 = sst [smem:[#allocation24_spill]] %s3078_s13 }
   0x6   :  { %3103 = sst [smem:[#allocation25_spill]] %s3079_s14 }
   0x7   :  { %3104 = sst [smem:[#allocation26_spill]] %s3080_s15 }
   0x8   :  { %3105 = sst [smem:[#allocation27_spill]] %s3081_s16 }
   0x9   :  { %21 = vsyncpa [#allocation6], 0 }
   0xa   :  { %23 = vsyncpa [#allocation6 + $0x1], 0  ;;  %s2553_s21 = smov 0   ;;  %s2555_s22 = smov 0  }
   0xb   :  { %s2557_s23 = smov 0   ;;  %s2559_s24 = smov 0  }
   0xc   :  { %s2561_s25 = smov 0   ;;  %s2563_s26 = smov 0  }
   0xd   :  { %s2565_s27 = smov 0   ;;  %s2567_s28 = smov 0  }
   0xe LB: > { %3106 = sst [smem:[#allocation8_spill]] %s2433_s21  ;;  %s1895_s29 = sadd.s32 4294967295, %s2461_s28   ;;  %s2461_s28 = sphi %s2567_s28, %s29_s28   ;;  %s2457_s27 = sphi %s2565_s27, %s3142_s27   ;;  %s2453_s26 = sphi %s2563_s26, %s3141_s26   ;;  %s2449_s25 = sphi %s2561_s25, %s3140_s25   ;;  %s2445_s24 = sphi %s2559_s24, %s3139_s24   ;;  %s2441_s23 = sphi %s2557_s23, %s3138_s23   ;;  %s2437_s22 = sphi %s2555_s22, %s3137_s22   ;;  %s2433_s21 = sphi %s2553_s21, %s3136_s21  }
   0xf   : > { %3107 = sst [smem:[#allocation9_spill]] %s2437_s22  ;;  %s1896_s30 = sadd.s32 4294967294, %s2461_s28  }
  0x10   : > { %3108 = sst [smem:[#allocation10_spill]] %s2441_s23  ;;  %s38_s0 = sadd.s32 1, %s2453_s26 }
  0x11   : > { %3109 = sst [smem:[#allocation11_spill]] %s2449_s25  ;;  %p39_p0 = scmp.ge.s32.totalorder %s38_s0, 4 }
  0x12   : > { %3110 = sst [smem:[#allocation12_spill]] %s2453_s26  ;;  %s41_s17 = sadd.s32 1, %s2457_s27 }
  0x13   : > { %3111 = sst [smem:[#allocation13_spill]] %s2457_s27  ;;  %p439_p1 = scmp.ne.s32.totalorder %s2441_s23, %s2437_s22 }
  0x14   : > { %3112 = sst [smem:[#allocation14_spill]] %s2461_s28  ;;  %p440_p2 = scmp.eq.s32.totalorder %s1895_s29, 7 }
  0x15   : > { %s3144_s0 = smov (%p39_p0, %s38_s0), 0  ;;  %s3146_s17 = smov (!%p39_p0, %s41_s17), %s2457_s27 }
  0x16   : > { %3113 = sst [smem:[#allocation15_spill]] %s3144_s0  ;;  %p2602_p3 = por %p440_p2, %p439_p1 }
  0x17   : > { %p445_p4 = scmp.ne.s32.totalorder %s2437_s22, %s2433_s21  ;;  %p43_p5 = scmp.ge.s32.totalorder %s3146_s17, 2 }
  0x18   : > { %s3114_s18 = scalar_select %p2602_p3, 1, 0 }
  0x19   : > { %p446_p6 = scmp.eq.s32.totalorder %s1896_s30, 7  ;;  %p1899_p7 = scmp.ge.s32.totalorder %s2461_s28, 1 }
  0x1a   : > { %3115 = sst [smem:[#allocation16_spill]] %s3114_s18  ;;  %p551_p8 = scmp.lt.s32.totalorder %s2461_s28, 9 }
  0x1b   : > { %s3148_s17 = smov (%p43_p5, %s3146_s17), 0  ;;  %p2612_p9 = por %p446_p6, %p445_p4 }
  0x1c   : > { %3116 = sst [smem:[#allocation17_spill]] %s3148_s17  ;;  %p552_p10 = pnand %p1899_p7, %p551_p8 }
  0x1d   : > { %s3117_s19 = scalar_select %p2612_p9, 1, 0 }
  0x1e   : > { %s426_s20 = ssub.s32 %s2457_s27, %s3148_s17  ;;  %s429_s29 = sadd.s32 1, %s2441_s23 }
  0x1f   : > { %3118 = sst [smem:[#allocation18_spill]] %s3117_s19  ;;  %p427_p11 = scmp.eq.s32.totalorder %s426_s20, 0 }
  0x20   : > { %555 = sbr.rel (%p552_p10) target bundleno = 1832 (0x728), region = 84  ;;  %s3091_s30 = sand.u32 (!%p552_p10), 1, %s2437_s22  }
  0x21   : > { %s2620_s0 = scalar_select %p427_p11, %s2441_s23, %s429_s29  }
  0x22   : > { %p635_p12 = scmp.lt.s32.totalorder (!%p552_p10), %s2449_s25, 1  ;;  %s1900_s26 = sshll.u32 (!%p552_p10), %s3091_s30, 5 }
  0x23   : > { %3119 = sst [smem:[#allocation19_spill]] %s2620_s0  ;;  %p645_p13 = scmp.lt.s32.totalorder (!%p552_p10), %s2445_s24, 3 }
  0x24   : > { %s3120_s27 = sld [smem:[#allocation20_spill]] (!%p552_p10)  ;;  %p1913_p0 = scmp.ne.s32.totalorder (!%p552_p10), %s2445_s24, 0 }
  0x25   : > { %s636_s21 = scalar_select %p635_p12, %s2449_s25, 1 }
  0x26   : > { %s2629_s19 = scalar_select %p645_p13, %s2445_s24, 3 }
  0x27   : > { %s2166_s20 = sshll.u32 %s636_s21, 5  ;;  %s3121_s1 = sld [smem:[#allocation21_spill]] }
  0x28   : > { %s2168_s30 = sshll.u32 %s2629_s19, 6  ;;  %s3122_s2 = sld [smem:[#allocation22_spill]] }
  0x29   : > { %s660_s23 = scalar_lea.vmem %s3070_s5, %s2629_s19  ;;  %s668_s13 = scalar_lea.vmem %s3072_s7, %s2629_s19 }
  0x2a   : > { %s2634_s0 = scalar_lea.vmem %s3120_s27, %s2166_s20  ;;  %s2654_s27 = scalar_lea.vmem %s3069_s4, %s2168_s30 }
  0x2b   : > { %s2171_s15 = sshll.u32 %s2629_s19, 4  ;;  %s2675_s21 = scalar_lea.vmem [#allocation5], %s1900_s26 }
  0x2c   : > { %s2673_s12 = scalar_lea.vmem %s3073_s8, %s2171_s15  ;;  %678 = sbr.rel (%p1913_p0) target bundleno = 328 (0x148), region = 88 }
  0x2d   : > { %s2639_s16 = scalar_lea.vmem %s3121_s1, %s2166_s20  ;;  %s2663_s1 = scalar_lea.vmem %s3071_s6, %s2168_s30 }
  0x2e   : > { %s2649_s14 = scalar_lea.vmem %s3122_s2, %s2168_s30 }
  0x31   : > { %v681_v0 = vld [vmem:[%s2634_s0 + $0x10] sm:$0xff]  ;;  %v679_v1 = vld [vmem:[%s2634_s0] sm:$0xff]  ;;  %v682_v2 = vld [vmem:[%s2634_s0 + $0x18] sm:$0xff]  ;;  %v2463_v4 = vmov 128.0   ;;  %vm806_vm5 = vcmask 261120   ;;  %v2464_v39 = vmov 0.0  }
  0x32   : > { %689 = vadd.xlane.f32.xlu1 %v681_v0  ;;  %685 = vadd.xlane.f32.xlu0 %v679_v1  ;;  %v680_v3 = vld [vmem:[%s2634_s0 + $0x8] sm:$0xff]  ;;  %2324 = vrcp.f32 %v2463_v4  ;;  %v794_v33 = vld [vmem:[%s2639_s16] sm:$0xff]  ;;  %v796_v35 = vld [vmem:[%s2639_s16 + $0x10] sm:$0xff]  ;;  %811 = vst [vmem:[#allocation4 + $0x8] sm:$0xff] %v2464_v39 }
  0x33   : > { %v795_v34 = vld [vmem:[%s2639_s16 + $0x8] sm:$0xff]  ;;  %v797_v36 = vld [vmem:[%s2639_s16 + $0x18] sm:$0xff]  ;;  %vm798_vm1 = vcmp.eq.f32.partialorder %v794_v33, 0.0  ;;  %vm800_vm3 = vcmp.eq.f32.partialorder %v796_v35, 0.0  ;;  %812 = vst [vmem:[#allocation4 + $0x10] sm:$0xff] %v2464_v39 }
  0x34   : > { %vm799_vm2 = vcmp.eq.f32.partialorder %v795_v34, 0.0  ;;  %vm801_vm4 = vcmp.eq.f32.partialorder %v797_v36, 0.0  ;;  %v802_v40 = vsel %vm798_vm1, -1e+09, %v2464_v39  ;;  %v804_v42 = vsel %vm800_vm3, -1e+09, %v2464_v39 }
  0x35   : > { %v803_v41 = vsel %vm799_vm2, -1e+09, %v2464_v39  ;;  %v805_v45 = vsel %vm801_vm4, -1e+09, %v2464_v39  ;;  %807 = vst.msk [vmem:[#allocation3] sm:$0xff] %vm806_vm5, %v802_v40 }
  0x36   : > { %808 = vst.msk [vmem:[#allocation3 + $0x8] sm:$0xff] %vm806_vm5, %v803_v41 }
  0x37   : > { %809 = vst.msk [vmem:[#allocation3 + $0x10] sm:$0xff] %vm806_vm5, %v804_v42 }
  0x38   : > { %v2325_v5 = vpop.eup %2324  ;;  %810 = vst.msk [vmem:[#allocation3 + $0x18] sm:$0xff] %vm806_vm5, %v805_v45 }
  0x39   : > { %v694_v6 = vmul.f32 128.0, %v2325_v5  ;;  %vm698_vm0 = vweird.f32 %v2325_v5  ;;  %813 = vst [vmem:[#allocation4] sm:$0xff] %v2464_v39 }
  0x3a   : > { %691 = vadd.xlane.f32.xlu1 %v682_v2  ;;  %687 = vadd.xlane.f32.xlu0 %v680_v3  ;;  %814 = vst [vmem:[#allocation4 + $0x18] sm:$0xff] %v2464_v39 }
  0x3b   : > { %v695_v7 = vsub.f32 1.0, %v694_v6 }
  0x3d   : > { %v696_v8 = vmul.f32 %v2325_v5, %v695_v7  ;;  %v2322_v7 = vld [vmem:[%s3075_s10] ss:$0 sm:$0xff] }
  0x3f   : > { %v697_v9 = vadd.f32 %v2325_v5, %v696_v8 }
  0x41   : > { %v699_v10 = vsel %vm698_vm0, %v2325_v5, %v697_v9 }
  0xa5   : > { %v690_v11 = vpop.xlane.xlu1 %689  ;;  %v686_v12 = vpop.xlane.xlu0 %685 }
  0xa6   : > { %v702_v13 = vmul.f32 %v699_v10, %v690_v11  ;;  %v700_v14 = vmul.f32 %v699_v10, %v686_v12 }
  0xa8   : > { %v2682_v15 = vsub.f32 %v681_v0, %v702_v13  ;;  %v2684_v16 = vsub.f32 %v679_v1, %v700_v14  ;;  %v2323_v14 = vld [vmem:[%s3076_s11] ss:$0 sm:$0xff] }
  0xaa   : > { %v710_v17 = vmul.f32 %v2682_v15, %v2682_v15  ;;  %v708_v18 = vmul.f32 %v2684_v16, %v2684_v16 }
  0xac   : > { %716 = vadd.xlane.f32.xlu0 %v710_v17  ;;  %712 = vadd.xlane.f32.xlu2 %v708_v18 }
  0xad   : > { %v692_v19 = vpop.xlane.xlu1 %691  ;;  %v688_v20 = vpop.xlane.xlu0 %687 }
  0xae   : > { %v703_v21 = vmul.f32 %v699_v10, %v692_v19  ;;  %v701_v22 = vmul.f32 %v699_v10, %v688_v20 }
  0xb0   : > { %v2690_v23 = vsub.f32 %v682_v2, %v703_v21  ;;  %v2692_v24 = vsub.f32 %v680_v3, %v701_v22 }
  0xb2   : > { %v711_v25 = vmul.f32 %v2690_v23, %v2690_v23  ;;  %v709_v26 = vmul.f32 %v2692_v24, %v2692_v24 }
  0xb4   : > { %718 = vadd.xlane.f32.xlu1 %v711_v25  ;;  %714 = vadd.xlane.f32.xlu2 %v709_v26 }
 0x11f   : > { %v713_v27 = vpop.xlane.xlu2 %712  ;;  %v717_v28 = vpop.xlane.xlu0 %716 }
 0x120   : > { %v720_v29 = vmul.f32 %v713_v27, %v699_v10  ;;  %v722_v30 = vmul.f32 %v717_v28, %v699_v10 }
 0x122   : > { %v724_v31 = vadd.f32 1e-06, %v720_v29  ;;  %v726_v32 = vadd.f32 1e-06, %v722_v30 }
 0x124   : > { %2326 = vrsqrt.f32 %v724_v31  ;;  %vm754_vm8 = vweird.f32 %v726_v32  ;;  %vm734_vm9 = vweird.f32 %v724_v31 }
 0x125   : > { %2328 = vrsqrt.f32 %v726_v32 }
 0x127   : > { %v719_v37 = vpop.xlane.xlu1 %718  ;;  %v715_v38 = vpop.xlane.xlu2 %714 }
 0x128   : > { %v723_v43 = vmul.f32 %v719_v37, %v699_v10  ;;  %v721_v44 = vmul.f32 %v715_v38, %v699_v10 }
 0x12a   : > { %v2327_v46 = vpop.eup %2326  ;;  %v727_v47 = vadd.f32 1e-06, %v723_v43  ;;  %v725_v48 = vadd.f32 1e-06, %v721_v44 }
 0x12b   : > { %v2329_v49 = vpop.eup %2328  ;;  %v729_v50 = vmul.f32 %v2327_v46, %v724_v31  ;;  %vm735_vm7 = vweird.f32 %v2327_v46 }
 0x12c   : > { %v749_v51 = vmul.f32 %v2329_v49, %v726_v32  ;;  %2330 = vrsqrt.f32 %v727_v47  ;;  %vm755_vm6 = vweird.f32 %v2329_v49  ;;  %vm736_vm11 = vmor %vm734_vm9, %vm735_vm7  ;;  %vm764_vm14 = vweird.f32 %v727_v47 }
 0x12d   : > { %v730_v52 = vmul.f32 %v2327_v46, %v729_v50  ;;  %2332 = vrsqrt.f32 %v725_v48  ;;  %vm756_vm10 = vmor %vm754_vm8, %vm755_vm6  ;;  %vm744_vm0 = vweird.f32 %v725_v48 }
 0x12e   : > { %v750_v53 = vmul.f32 %v2329_v49, %v749_v51 }
 0x12f   : > { %v731_v54 = vmul.f32 0.5, %v730_v52 }
 0x130   : > { %v751_v55 = vmul.f32 0.5, %v750_v53 }
 0x131   : > { %v732_v56 = vsub.f32 1.5, %v731_v54 }
 0x132   : > { %v2331_v57 = vpop.eup %2330  ;;  %v752_v58 = vsub.f32 1.5, %v751_v55 }
 0x133   : > { %v2333_v59 = vpop.eup %2332  ;;  %v759_v60 = vmul.f32 %v2331_v57, %v727_v47  ;;  %v733_v61 = vmul.f32 %v2327_v46, %v732_v56  ;;  %vm765_vm12 = vweird.f32 %v2331_v57 }
 0x134   : > { %v753_v62 = vmul.f32 %v2329_v49, %v752_v58  ;;  %v739_v63 = vmul.f32 %v2333_v59, %v725_v48  ;;  %vm745_vm13 = vweird.f32 %v2333_v59  ;;  %vm766_vm15 = vmor %vm764_vm14, %vm765_vm12 }
 0x135   : > { %v760_v0 = vmul.f32 %v2331_v57, %v759_v60  ;;  %v737_v4 = vsel %vm736_vm11, %v2327_v46, %v733_v61  ;;  %vm746_vm1 = vmor %vm744_vm0, %vm745_vm13 }
 0x136   : > { %v740_v1 = vmul.f32 %v2333_v59, %v739_v63  ;;  %v757_v2 = vsel %vm756_vm10, %v2329_v49, %v753_v62  ;;  %v768_v10 = vmul.f32 %v737_v4, %v2684_v16 }
 0x137   : > { %v761_v3 = vmul.f32 0.5, %v760_v0  ;;  %v770_v8 = vmul.f32 %v757_v2, %v2682_v15 }
 0x138   : > { %v741_v5 = vmul.f32 0.5, %v740_v1  ;;  %v775_v15 = vmul.f32 %v2322_v7, %v768_v10 }
 0x139   : > { %v762_v6 = vsub.f32 1.5, %v761_v3  ;;  %v777_v17 = vmul.f32 %v2322_v7, %v770_v8 }
 0x13a   : > { %v742_v9 = vsub.f32 1.5, %v741_v5  ;;  %v782_v26 = vadd.f32 %v2323_v14, %v775_v15 }
 0x13b   : > { %v763_v11 = vmul.f32 %v2331_v57, %v762_v6  ;;  %v784_v22 = vadd.f32 %v2323_v14, %v777_v17 }
 0x13c   : > { %v743_v12 = vmul.f32 %v2333_v59, %v742_v9 }
 0x13d   : > { %v767_v13 = vsel %vm766_vm15, %v2331_v57, %v763_v11 }
 0x13e   : > { %v771_v18 = vmul.f32 %v767_v13, %v2690_v23  ;;  %v747_v19 = vsel %vm746_vm1, %v2333_v59, %v743_v12 }
 0x13f   : > { %v769_v20 = vmul.f32 %v747_v19, %v2692_v24 }
 0x140   : > { %v778_v21 = vmul.f32 %v2322_v7, %v771_v18 }
 0x141   : > { %v776_v16 = vmul.f32 %v2322_v7, %v769_v20 }
 0x142   : > { %v785_v25 = vadd.f32 %v2323_v14, %v778_v21 }
 0x143   : > { %v783_v27 = vadd.f32 %v2323_v14, %v776_v16 }
 0x144   : > { %v2241_v28 = vpack.c.bf16 %v785_v25, %v784_v22 }
 0x145   : > { %v2236_v29 = vpack.c.bf16 %v783_v27, %v782_v26 }
 0x146   : > { %2243 = vst [vmem:[#allocation2 + $0x8] sm:$0xff] %v2241_v28  }
 0x147   : > { %2237 = vst [vmem:[#allocation2] sm:$0xff] %v2236_v29  }
 0x148 PF: > { %v2189_v23 = vld [vmem:[%s2654_s27 + $0x38] sm:$0xff]  ;;  %v2188_v24 = vld [vmem:[%s2654_s27 + $0x30] sm:$0xff]  ;;  %v2187_v32 = vld [vmem:[%s2654_s27 + $0x28] sm:$0xff]  ;;  %vm1100_vm2 = vcmask 261120   ;;  %s3123_s29 = scalar_lea.vmem %s3068_s3, %s2629_s19  ;;  %p2032_p1 = scmp.ne.s32.totalorder %s2445_s24, 3 }
 0x149   : > { %986 = vmatpush.bf16.msra.mxu1 %v2189_v23  ;;  %v2181_v30 = vld [vmem:[%s2649_s14 + $0x38] sm:$0xff]  ;;  %v2180_v31 = vld [vmem:[%s2649_s14 + $0x30] sm:$0xff]  ;;  %v2179_v33 = vld [vmem:[%s2649_s14 + $0x28] sm:$0xff]  ;;  %s3124_s20 = sld [smem:[#allocation23_spill]] (!%p2032_p1) }
 0x14a   : > { %899 = vmatpush.bf16.msra.mxu0 %v2181_v30  ;;  %v2186_v34 = vld [vmem:[%s2654_s27 + $0x20] sm:$0xff]  ;;  %v2185_v36 = vld [vmem:[%s2654_s27 + $0x18] sm:$0xff]  ;;  %v2184_v38 = vld [vmem:[%s2654_s27 + $0x10] sm:$0xff]  ;;  %s3127_s16 = sld [smem:[#allocation26_spill]] (!%p2032_p1) }
 0x14b   : > { %v2178_v35 = vld [vmem:[%s2649_s14 + $0x20] sm:$0xff]  ;;  %v2177_v37 = vld [vmem:[%s2649_s14 + $0x18] sm:$0xff]  ;;  %v2176_v39 = vld [vmem:[%s2649_s14 + $0x10] sm:$0xff] }
 0x14c   : > { %v2183_v40 = vld [vmem:[%s2654_s27 + $0x8] sm:$0xff]  ;;  %v2182_v42 = vld [vmem:[%s2654_s27] sm:$0xff]  ;;  %v2197_v6 = vld [vmem:[%s2663_s1 + $0x38] sm:$0xff] }
 0x14d   : > { %987 = vmatpush.bf16.msra.mxu1 %v2188_v24  ;;  %v2175_v41 = vld [vmem:[%s2649_s14 + $0x8] sm:$0xff]  ;;  %v2174_v43 = vld [vmem:[%s2649_s14] sm:$0xff]  ;;  %1073 = vmatpush.bf16.msra.mxu2 %v2197_v6  ;;  %v2196_v7 = vld [vmem:[%s2663_s1 + $0x30] sm:$0xff] }
 0x14e   : > { %900 = vmatpush.bf16.msra.mxu0 %v2180_v31  ;;  %v2732_v44 = vld [vmem:[#allocation2] sm:$0xff]  ;;  %v2736_v45 = vld [vmem:[#allocation2 + $0x8] sm:$0xff]  ;;  %v2193_v10 = vld [vmem:[%s2663_s1 + $0x18] sm:$0xff] }
 0x14f   : > { %v2334_v50 = vld [vmem:[%s660_s23] ss:$0 sm:$0xff]  ;;  %v2195_v8 = vld [vmem:[%s2663_s1 + $0x28] sm:$0xff]  ;;  %v1096_v11 = vld [vmem:[#allocation3] sm:$0xff] }
 0x150   : > { %v2335_v60 = vld [vmem:[%s3123_s29] ss:$0 sm:$0xff]  ;;  %v2192_v12 = vld [vmem:[%s2663_s1 + $0x10] sm:$0xff]  ;;  %v2191_v18 = vld [vmem:[%s2663_s1 + $0x8] sm:$0xff] }
 0x151   : > { %988 = vmatpush.bf16.msra.mxu1 %v2187_v32  ;;  %1074 = vmatpush.bf16.msra.mxu2 %v2196_v7  ;;  %v2194_v9 = vld [vmem:[%s2663_s1 + $0x20] sm:$0xff]  ;;  %v1097_v19 = vld [vmem:[#allocation3 + $0x8] sm:$0xff]  ;;  %v1099_v28 = vld [vmem:[#allocation3 + $0x18] sm:$0xff] }
 0x152   : > { %901 = vmatpush.bf16.msra.mxu0 %v2179_v33  ;;  %v2190_v15 = vld [vmem:[%s2663_s1] sm:$0xff] }
 0x153   : > { %v1098_v22 = vld [vmem:[#allocation3 + $0x10] sm:$0xff] }
 0x155   : > { %989 = vmatpush.bf16.msra.mxu1 %v2186_v34  ;;  %1075 = vmatpush.bf16.msra.mxu2 %v2195_v8 }
 0x156   : > { %902 = vmatpush.bf16.msra.mxu0 %v2178_v35 }
 0x159   : > { %990 = vmatpush.bf16.msra.mxu1 %v2185_v36  ;;  %1076 = vmatpush.bf16.msra.mxu2 %v2194_v9 }
 0x15a   : > { %903 = vmatpush.bf16.msra.mxu0 %v2177_v37 }
 0x15d   : > { %991 = vmatpush.bf16.msra.mxu1 %v2184_v38  ;;  %1077 = vmatpush.bf16.msra.mxu2 %v2193_v10 }
 0x15e   : > { %904 = vmatpush.bf16.msra.mxu0 %v2176_v39 }
 0x161   : > { %992 = vmatpush.bf16.msra.mxu1 %v2183_v40  ;;  %1078 = vmatpush.bf16.msra.mxu2 %v2192_v12  ;;  %v2198_v12 = vld [vmem:[%s2673_s12] sm:$0xff] }
 0x162   : > { %905 = vmatpush.bf16.msra.mxu0 %v2175_v41 }
 0x165   : > { %993 = vmatpush.bf16.msra.mxu1 %v2182_v42  ;;  %1079 = vmatpush.bf16.msra.mxu2 %v2191_v18 }
 0x166   : > { %906 = vmatpush.bf16.msra.mxu0 %v2174_v43 }
 0x168   : > { %994 = vmatmul.bf16.vlgmr.msra.gmra.mxu1 %v2732_v44 }
 0x169   : > { %907 = vmatmul.bf16.vlgmr.msra.gmra.mxu0 %v2732_v44  ;;  %1080 = vmatpush.bf16.msra.mxu2 %v2190_v15 }
 0x16c   : > { %1081 = vmatmul.bf16.vlgmr.msra.gmra.mxu2 %v2732_v44 }
 0x178   : > { %999 = vmatmul.bf16.gmra.mxu1 %v2736_v45 }
 0x179   : > { %912 = vmatmul.bf16.gmra.mxu0 %v2736_v45 }
 0x17c   : > { %1086 = vmatmul.bf16.gmra.mxu2 %v2736_v45 }
 0x1e5   : > { %v995_v46 = vpop.f32.mrf.mxu1 }
 0x1e6   : > { %v908_v49 = vpop.f32.mrf.mxu0  ;;  %v996_v57 = vadd.f32 %v2334_v50, %v995_v46 }
 0x1e7   : > { %v909_v62 = vadd.f32 %v2335_v60, %v908_v49 }
 0x1ed   : > { %v997_v47 = vpop.f32.mrf.mxu1 }
 0x1ee   : > { %v998_v55 = vadd.f32 %v2334_v50, %v997_v47  ;;  %v910_v58 = vpop.f32.mrf.mxu0 }
 0x1ef   : > { %v911_v63 = vadd.f32 %v2335_v60, %v910_v58  ;;  %v1082_v45 = vpop.f32.mrf.mxu2 }
 0x1f0   : > { %v1094_v59 = vpack.c.bf16 %v998_v55, %v996_v57 }
 0x1f1   : > { %v1092_v1 = vpack.c.bf16 %v911_v63, %v909_v62  ;;  %v2199_v62 = vld [vmem:[%s2673_s12 + $0x8] sm:$0xff]  ;;  %s3125_s12 = sld [smem:[#allocation25_spill]] (!%p2032_p1) }
 0x1f2   : > { %v1108_v61 = vsel %vm1100_vm2, %v1094_v59, 0  ;;  %1239 = vmatpush.bf16.msrb.mxu0 %v2199_v62  ;;  %2244 = vmatpush.bf16.msrb.mxu1 %v2199_v62 }
 0x1f5   : > { %v1000_v48 = vpop.f32.mrf.mxu1 }
 0x1f6   : > { %v1001_v52 = vadd.f32 %v2334_v50, %v1000_v48  ;;  %v913_v0 = vpop.f32.mrf.mxu0  ;;  %1240 = vmatpush.bf16.msrb.mxu0 %v2198_v12  ;;  %2245 = vmatpush.bf16.msrb.mxu1 %v2198_v12 }
 0x1f7   : > { %v914_v3 = vadd.f32 %v2335_v60, %v913_v0  ;;  %v1084_v49 = vpop.f32.mrf.mxu2 }
 0x1fd   : > { %v1002_v51 = vpop.f32.mrf.mxu1 }
 0x1fe   : > { %v1003_v53 = vadd.f32 %v2334_v50, %v1002_v51  ;;  %v915_v2 = vpop.f32.mrf.mxu0 }
 0x1ff   : > { %v916_v4 = vadd.f32 %v2335_v60, %v915_v2 }
 0x200   : > { %v1095_v54 = vpack.c.bf16 %v1003_v53, %v1001_v52  ;;  %v1087_v52 = vpop.f32.mrf.mxu2  ;;  %v2336_v53 = vld [vmem:[%s668_s13] ss:$0 sm:$0xff]  ;;  %s3126_s13 = sld [smem:[#allocation24_spill]] (!%p2032_p1) }
 0x201   : > { %v1093_v5 = vpack.c.bf16 %v916_v4, %v914_v3  ;;  %v1085_v57 = vadd.f32 %v2336_v53, %v1084_v49 }
 0x202   : > { %v1111_v56 = vsel %vm1100_vm2, %v1095_v54, 0  ;;  %v1088_v54 = vadd.f32 %v2336_v53, %v1087_v52 }
 0x203   : > { %1119 = vmatpush.bf16.xpose.msra.mxu3 %v1111_v56  ;;  %v1083_v56 = vadd.f32 %v2336_v53, %v1082_v45 }
 0x205   : > { %v1178_v60 = vpack.c.bf16 %v1085_v57, %v1083_v56 }
 0x208   : > { %v1089_v55 = vpop.f32.mrf.mxu2 }
 0x209   : > { %v1090_v58 = vadd.f32 %v2336_v53, %v1089_v55 }
 0x20b   : > { %1120 = vmatpush.bf16.xpose.msra.mxu3 %v1108_v61  ;;  %v1179_v59 = vpack.c.bf16 %v1090_v58, %v1088_v54 }
 0x212   : > { %2018 = vmatmul.msk.bf16.vlgmr.msra.gmra.mxu3 %vm1100_vm2, %v1092_v1 }
 0x213   : > { %1192 = vmatpush.bf16.msrb.mxu3 %v1179_v59 }
 0x217   : > { %1193 = vmatpush.bf16.msrb.mxu3 %v1178_v60 }
 0x222   : > { %2019 = vmatmul.msk.bf16.gmra.mxu3 %vm1100_vm2, %v1093_v5 }
 0x295   : > { %v1122_v13 = vpop.f32.mrf.mxu3 }
 0x296   : > { %v1123_v14 = vadd.f32 %v1122_v13, %v1096_v11 }
 0x298   : > { %v1132_v17 = vsel %vm1100_vm2, %v1123_v14, -inf }
 0x299   : > { %1133 = vmax.xlane.f32.xlu0 %v1132_v17 }
 0x29d   : > { %v1124_v20 = vpop.f32.mrf.mxu3 }
 0x29e   : > { %v1125_v21 = vadd.f32 %v1124_v20, %v1097_v19  ;;  %v1205_v20 = vld [vmem:[#allocation4 + $0x8] sm:$0xff] }
 0x2a0   : > { %v1135_v16 = vsel %vm1100_vm2, %v1125_v21, -inf }
 0x2a1   : > { %1136 = vmax.xlane.f32.xlu0 %v1135_v16 }
 0x2a5   : > { %v1127_v25 = vpop.f32.mrf.mxu3 }
 0x2a6   : > { %v1128_v26 = vadd.f32 %v1127_v25, %v1098_v22  ;;  %v1206_v22 = vld [vmem:[#allocation4 + $0x10] sm:$0xff] }
 0x2a8   : > { %v1138_v27 = vsel %vm1100_vm2, %v1128_v26, -inf }
 0x2a9   : > { %1139 = vmax.xlane.f32.xlu1 %v1138_v27  ;;  %v1207_v27 = vld [vmem:[#allocation4] sm:$0xff] }
 0x2ad   : > { %v1129_v29 = vpop.f32.mrf.mxu3 }
 0x2ae   : > { %v1130_v23 = vadd.f32 %v1129_v29, %v1099_v28 }
 0x2b0   : > { %v1141_v24 = vsel %vm1100_vm2, %v1130_v23, -inf }
 0x2b1   : > { %1142 = vmax.xlane.f32.xlu1 %v1141_v24 }
 0x30c   : > { %v1134_v30 = vpop.xlane.xlu0 %1133 }
 0x30d   : > { %v1144_v31 = vsub.f32 %v1123_v14, %v1134_v30 }
 0x30f   : > { %v1148_v32 = vmul.f32 1.442695, %v1144_v31 }
 0x311   : > { %2337 = vpow2.f32 %v1148_v32 }
 0x314   : > { %v1137_v33 = vpop.xlane.xlu0 %1136 }
 0x315   : > { %v1145_v34 = vsub.f32 %v1125_v21, %v1137_v33 }
 0x317   : > { %v2338_v35 = vpop.eup %2337  ;;  %v1150_v36 = vmul.f32 1.442695, %v1145_v34 }
 0x318   : > { %v1156_v37 = vsel %vm1100_vm2, %v2338_v35, 0.0 }
 0x319   : > { %2339 = vpow2.f32 %v1150_v36  ;;  %1157 = vadd.xlane.f32.xlu2 %v1156_v37 }
 0x31c   : > { %v1140_v38 = vpop.xlane.xlu1 %1139 }
 0x31d   : > { %v1146_v39 = vsub.f32 %v1128_v26, %v1140_v38 }
 0x31f   : > { %v2340_v40 = vpop.eup %2339  ;;  %v1152_v41 = vmul.f32 1.442695, %v1146_v39 }
 0x320   : > { %v1159_v42 = vsel %vm1100_vm2, %v2340_v40, 0.0 }
 0x321   : > { %2341 = vpow2.f32 %v1152_v41  ;;  %1160 = vadd.xlane.f32.xlu2 %v1159_v42 }
 0x324   : > { %v1143_v43 = vpop.xlane.xlu1 %1142 }
 0x325   : > { %v1147_v44 = vsub.f32 %v1130_v23, %v1143_v43  ;;  %v1208_v23 = vld [vmem:[#allocation4 + $0x18] sm:$0xff] }
 0x327   : > { %v2342_v46 = vpop.eup %2341  ;;  %v1154_v47 = vmul.f32 1.442695, %v1147_v44 }
 0x328   : > { %v1162_v48 = vsel %vm1100_vm2, %v2342_v46, 0.0 }
 0x329   : > { %2343 = vpow2.f32 %v1154_v47  ;;  %1163 = vadd.xlane.f32.xlu0 %v1162_v48 }
 0x32f   : > { %v2344_v50 = vpop.eup %2343 }
 0x330   : > { %v1165_v51 = vsel %vm1100_vm2, %v2344_v50, 0.0 }
 0x331   : > { %1166 = vadd.xlane.f32.xlu1 %v1165_v51 }
 0x38c   : > { %v1158_v61 = vpop.xlane.xlu2 %1157 }
 0x38d   : > { %2345 = vrcp.f32 %v1158_v61 }
 0x393   : > { %v2346_v0 = vpop.eup %2345 }
 0x394   : > { %v1161_v63 = vpop.xlane.xlu2 %1160  ;;  %v1172_v2 = vmul.f32 %v2346_v0, %v2338_v35 }
 0x395   : > { %2347 = vrcp.f32 %v1161_v63 }
 0x39b   : > { %v2348_v1 = vpop.eup %2347 }
 0x39c   : > { %v1173_v3 = vmul.f32 %v2348_v1, %v2340_v40  ;;  %v1164_v5 = vpop.xlane.xlu0 %1163 }
 0x39d   : > { %2349 = vrcp.f32 %v1164_v5 }
 0x39e   : > { %v1176_v4 = vpack.c.bf16 %v1173_v3, %v1172_v2 }
 0x3a0   : > { %2020 = vmatmul.msk.bf16.vlgmr.msrb.gmra.mxu3 %vm1100_vm2, %v1176_v4 }
 0x3a3   : > { %v2350_v7 = vpop.eup %2349 }
 0x3a4   : > { %v1167_v6 = vpop.xlane.xlu1 %1166  ;;  %v1174_v9 = vmul.f32 %v2350_v7, %v2342_v46 }
 0x3a5   : > { %2351 = vrcp.f32 %v1167_v6 }
 0x3ab   : > { %v2352_v8 = vpop.eup %2351 }
 0x3ac   : > { %v1175_v10 = vmul.f32 %v2352_v8, %v2344_v50 }
 0x3ae   : > { %v1177_v11 = vpack.c.bf16 %v1175_v10, %v1174_v9 }
 0x3b0   : > { %2021 = vmatmul.msk.bf16.gmra.mxu3 %vm1100_vm2, %v1177_v11 }
 0x423   : > { %v1195_v13 = vpop.f32.mrf.mxu3 }
 0x42b   : > { %v1197_v14 = vpop.f32.mrf.mxu3 }
 0x42c   : > { %v1209_v17 = vpack.c.bf16 %v1197_v14, %v1195_v13 }
 0x42e   : > { %2030 = vmatmul.msk.bf16.vlgmr.msrb.gmra.mxu0 %vm1100_vm2, %v1209_v17 }
 0x433   : > { %v1200_v18 = vpop.f32.mrf.mxu3 }
 0x43b   : > { %v1202_v19 = vpop.f32.mrf.mxu3 }
 0x43c   : > { %v1210_v15 = vpack.c.bf16 %v1202_v19, %v1200_v18 }
 0x43e   : > { %2031 = vmatmul.msk.bf16.vlgmr.msrb.gmra.mxu1 %vm1100_vm2, %v1210_v15 }
 0x4ab   : > { %v1242_v21 = vpop.f32.mrf.mxu0 }
 0x4ac   : > { %v1252_v16 = vadd.f32 %v1242_v21, %v1205_v20 }
 0x4ae   : > { %1256 = vst [vmem:[#allocation4 + $0x8] sm:$0xff] %v1252_v16 }
 0x4b3   : > { %v1244_v25 = vpop.f32.mrf.mxu0 }
 0x4b4   : > { %v1253_v26 = vadd.f32 %v1244_v25, %v1206_v22 }
 0x4b6   : > { %1257 = vst [vmem:[#allocation4 + $0x10] sm:$0xff] %v1253_v26 }
 0x4bb   : > { %v1247_v28 = vpop.f32.mrf.mxu1 }
 0x4bc   : > { %v1254_v29 = vadd.f32 %v1247_v28, %v1207_v27 }
 0x4be   : > { %1258 = vst [vmem:[#allocation4] sm:$0xff] %v1254_v29 }
 0x4c2   : > { %1263 = sbr.rel (%p2032_p1) target bundleno = 1809 (0x711), region = 92 }
 0x4c3   : > { %v1249_v24 = vpop.f32.mrf.mxu1 }
 0x4c4   : > { %v1255_v30 = vadd.f32 %v1249_v24, %v1208_v23 }
 0x4c6   : > { %1259 = vst [vmem:[#allocation4 + $0x18] sm:$0xff] %v1255_v30 }
 0x4c7   : > { %v1266_v31 = vld [vmem:[%s2634_s0 + $0x10] sm:$0xff]  ;;  %v2353_v34 = vld [vmem:[%s3074_s9] ss:$0 sm:$0xff]  ;;  %v1268_v36 = vld [vmem:[#allocation4 + $0x8] sm:$0xff]  ;;  %v2465_v48 = vmov 128.0  }
 0x4c8   : > { %v1270_v32 = vld [vmem:[#allocation4] sm:$0xff]  ;;  %v1264_v35 = vld [vmem:[%s2634_s0] sm:$0xff]  ;;  %v1267_v38 = vld [vmem:[%s2634_s0 + $0x18] sm:$0xff]  ;;  %2357 = vrcp.f32 %v2465_v48 }
 0x4c9   : > { %v1274_v33 = vadd.f32 %v1270_v32, %v1266_v31  ;;  %v1272_v37 = vadd.f32 %v1268_v36, %v1264_v35  ;;  %v1265_v40 = vld [vmem:[%s2634_s0 + $0x8] sm:$0xff]  ;;  %v1269_v42 = vld [vmem:[#allocation4 + $0x10] sm:$0xff]  ;;  %v2091_v7 = vld [vmem:[%s3124_s20 + $0x70] sm:$0xf] }
 0x4ca   : > { %v1273_v45 = vadd.f32 %v1269_v42, %v1265_v40  ;;  %v2215_v8 = vld [vmem:[%s3124_s20 + $0x74] sm:$0xf0]  ;;  %v2214_v9 = vld [vmem:[%s3124_s20 + $0x74] sm:$0xf]  ;;  %v2093_v11 = vld [vmem:[%s3124_s20 + $0x78] sm:$0xf0] }
 0x4cb   : > { %v2791_v41 = vadd.f32 %v2353_v34, %v1274_v33  ;;  %v2793_v43 = vadd.f32 %v2353_v34, %v1272_v37  ;;  %v2092_v10 = vor.u32 %v2215_v8, %v2091_v7  ;;  %v2096_v12 = vor.u32 %v2214_v9, %v2093_v11  ;;  %v2083_v13 = vld [vmem:[%s3124_s20 + $0x60] sm:$0xf]  ;;  %v2213_v14 = vld [vmem:[%s3124_s20 + $0x64] sm:$0xf0]  ;;  %v2212_v17 = vld [vmem:[%s3124_s20 + $0x64] sm:$0xf] }
 0x4cc   : > { %v2799_v47 = vadd.f32 %v2353_v34, %v1273_v45  ;;  %v2084_v18 = vor.u32 %v2213_v14, %v2083_v13  ;;  %v2085_v19 = vld [vmem:[%s3124_s20 + $0x68] sm:$0xf0]  ;;  %v2075_v20 = vld [vmem:[%s3124_s20 + $0x50] sm:$0xf]  ;;  %v2211_v21 = vld [vmem:[%s3124_s20 + $0x54] sm:$0xf0] }
 0x4cd   : > { %v1271_v39 = vld [vmem:[#allocation4 + $0x18] sm:$0xff]  ;;  %1290 = vadd.xlane.f32.xlu1 %v2791_v41  ;;  %1286 = vadd.xlane.f32.xlu0 %v2793_v43  ;;  %v2088_v15 = vor.u32 %v2212_v17, %v2085_v19  ;;  %v2210_v16 = vld [vmem:[%s3124_s20 + $0x54] sm:$0xf]  ;;  %v2076_v22 = vor.u32 %v2211_v21, %v2075_v20  ;;  %v2077_v25 = vld [vmem:[%s3124_s20 + $0x58] sm:$0xf0] }
 0x4ce   : > { %v1275_v44 = vadd.f32 %v1271_v39, %v1267_v38  ;;  %v2358_v49 = vpop.eup %2357  ;;  %1491 = vmatpush.bf16.msra.mxu0 %v2092_v10  ;;  %1510 = vmatpush.bf16.msra.mxu1 %v2096_v12  ;;  %v2080_v26 = vor.u32 %v2210_v16, %v2077_v25  ;;  %v2067_v27 = vld [vmem:[%s3124_s20 + $0x40] sm:$0xf]  ;;  %v2209_v28 = vld [vmem:[%s3124_s20 + $0x44] sm:$0xf0]  ;;  %v2208_v29 = vld [vmem:[%s3124_s20 + $0x44] sm:$0xf] }
 0x4cf   : > { %v1295_v50 = vmul.f32 128.0, %v2358_v49  ;;  %vm1299_vm3 = vweird.f32 %v2358_v49  ;;  %v2068_v23 = vor.u32 %v2209_v28, %v2067_v27  ;;  %v2069_v24 = vld [vmem:[%s3124_s20 + $0x48] sm:$0xf0]  ;;  %v2059_v31 = vld [vmem:[%s3124_s20 + $0x30] sm:$0xf]  ;;  %v2223_v27 = vld [vmem:[%s3125_s12 + $0x38] sm:$0xff] }
 0x4d0   : > { %v2797_v46 = vadd.f32 %v2353_v34, %v1275_v44  ;;  %v2072_v30 = vor.u32 %v2208_v29, %v2069_v24  ;;  %v2207_v32 = vld [vmem:[%s3124_s20 + $0x34] sm:$0xf0]  ;;  %v2206_v33 = vld [vmem:[%s3124_s20 + $0x34] sm:$0xf]  ;;  %v2061_v35 = vld [vmem:[%s3124_s20 + $0x38] sm:$0xf0]  ;;  %1673 = vmatpush.bf16.msra.mxu2 %v2223_v27 }
 0x4d1   : > { %v1296_v51 = vsub.f32 1.0, %v1295_v50  ;;  %v2060_v34 = vor.u32 %v2207_v32, %v2059_v31  ;;  %v2064_v36 = vor.u32 %v2206_v33, %v2061_v35  ;;  %v2051_v37 = vld [vmem:[%s3124_s20 + $0x20] sm:$0xf]  ;;  %v2205_v38 = vld [vmem:[%s3124_s20 + $0x24] sm:$0xf0]  ;;  %v2231_v28 = vld [vmem:[%s3125_s12 + $0x78] sm:$0xff] }
 0x4d2   : > { %1492 = vmatpush.bf16.msra.mxu0 %v2084_v18  ;;  %1511 = vmatpush.bf16.msra.mxu1 %v2088_v15  ;;  %v2204_v39 = vld [vmem:[%s3124_s20 + $0x24] sm:$0xf]  ;;  %v2052_v40 = vor.u32 %v2205_v38, %v2051_v37  ;;  %v2053_v42 = vld [vmem:[%s3124_s20 + $0x28] sm:$0xf0]  ;;  %v2043_v45 = vld [vmem:[%s3124_s20 + $0x10] sm:$0xf] }
 0x4d3   : > { %v1297_v52 = vmul.f32 %v2358_v49, %v1296_v51  ;;  %v2056_v44 = vor.u32 %v2204_v39, %v2053_v42  ;;  %v2203_v48 = vld [vmem:[%s3124_s20 + $0x14] sm:$0xf0]  ;;  %v2045_v51 = vld [vmem:[%s3124_s20 + $0x18] sm:$0xf0]  ;;  %1692 = vmatpush.bf16.msra.mxu3 %v2231_v28  ;;  %v2230_v31 = vld [vmem:[%s3125_s12 + $0x70] sm:$0xff] }
 0x4d4   : > { %v2044_v50 = vor.u32 %v2203_v48, %v2043_v45  ;;  %v2354_v35 = vld [vmem:[%s3075_s10] ss:$0 sm:$0xff]  ;;  %v2221_v38 = vld [vmem:[%s3125_s12 + $0x28] sm:$0xff] }
 0x4d5   : > { %1292 = vadd.xlane.f32.xlu1 %v2797_v46  ;;  %1288 = vadd.xlane.f32.xlu0 %v2799_v47  ;;  %v1298_v53 = vadd.f32 %v2358_v49, %v1297_v52  ;;  %v2035_v52 = vld [vmem:[%s3124_s20] sm:$0xf]  ;;  %v2229_v39 = vld [vmem:[%s3125_s12 + $0x68] sm:$0xff] }
 0x4d6   : > { %1493 = vmatpush.bf16.msra.mxu0 %v2076_v22  ;;  %1512 = vmatpush.bf16.msra.mxu1 %v2080_v26  ;;  %v2355_v45 = vld [vmem:[%s3076_s11] ss:$0 sm:$0xff] }
 0x4d7   : > { %v2803_v54 = vsel %vm1299_vm3, %v2358_v49, %v1298_v53  ;;  %v2202_v49 = vld [vmem:[%s3124_s20 + $0x14] sm:$0xf]  ;;  %v2201_v53 = vld [vmem:[%s3124_s20 + $0x4] sm:$0xf0]  ;;  %1693 = vmatpush.bf16.msra.mxu3 %v2230_v31 }
 0x4da   : > { %1494 = vmatpush.bf16.msra.mxu0 %v2068_v23  ;;  %1513 = vmatpush.bf16.msra.mxu1 %v2072_v30  ;;  %v2222_v30 = vld [vmem:[%s3125_s12 + $0x30] sm:$0xff] }
 0x4db   : > { %1674 = vmatpush.bf16.msra.mxu2 %v2222_v30  ;;  %1694 = vmatpush.bf16.msra.mxu3 %v2229_v39 }
 0x4de   : > { %1495 = vmatpush.bf16.msra.mxu0 %v2060_v34  ;;  %1514 = vmatpush.bf16.msra.mxu1 %v2064_v36 }
 0x4df   : > { %1675 = vmatpush.bf16.msra.mxu2 %v2221_v38 }
 0x4e2   : > { %1496 = vmatpush.bf16.msra.mxu0 %v2052_v40  ;;  %1515 = vmatpush.bf16.msra.mxu1 %v2056_v44 }
 0x4e6   : > { %1497 = vmatpush.bf16.msra.mxu0 %v2044_v50  ;;  %v2220_v50 = vld [vmem:[%s3125_s12 + $0x20] sm:$0xff] }
 0x4e7   : > { %1676 = vmatpush.bf16.msra.mxu2 %v2220_v50 }
 0x540   : > { %v1291_v55 = vpop.xlane.xlu1 %1290  ;;  %v1287_v57 = vpop.xlane.xlu0 %1286 }
 0x541   : > { %v1303_v56 = vmul.f32 %v2803_v54, %v1291_v55  ;;  %v1301_v58 = vmul.f32 %v2803_v54, %v1287_v57  ;;  %v2048_v55 = vor.u32 %v2202_v49, %v2045_v51  ;;  %v2037_v57 = vld [vmem:[%s3124_s20 + $0x8] sm:$0xf0] }
 0x543   : > { %v2808_v59 = vsub.f32 %v2791_v41, %v1303_v56  ;;  %v2811_v60 = vsub.f32 %v2793_v43, %v1301_v58  ;;  %v2200_v56 = vld [vmem:[%s3124_s20 + $0x4] sm:$0xf]  ;;  %1516 = vmatpush.bf16.msra.mxu1 %v2048_v55 }
 0x545   : > { %v1311_v61 = vmul.f32 %v2808_v59, %v2808_v59  ;;  %v1309_v62 = vmul.f32 %v2811_v60, %v2811_v60 }
 0x547   : > { %1317 = vadd.xlane.f32.xlu0 %v1311_v61  ;;  %1313 = vadd.xlane.f32.xlu2 %v1309_v62  ;;  %v2036_v62 = vor.u32 %v2201_v53, %v2035_v52 }
 0x548   : > { %v1293_v63 = vpop.xlane.xlu1 %1292  ;;  %v1289_v1 = vpop.xlane.xlu0 %1288 }
 0x549   : > { %v1304_v0 = vmul.f32 %v2803_v54, %v1293_v63  ;;  %v1302_v2 = vmul.f32 %v2803_v54, %v1289_v1  ;;  %1498 = vmatpush.bf16.msra.mxu0 %v2036_v62 }
 0x54b   : > { %v2820_v3 = vsub.f32 %v2797_v46, %v1304_v0  ;;  %v2823_v4 = vsub.f32 %v2799_v47, %v1302_v2  ;;  %v2040_v0 = vor.u32 %v2200_v56, %v2037_v57 }
 0x54d   : > { %v1312_v5 = vmul.f32 %v2820_v3, %v2820_v3  ;;  %v1310_v6 = vmul.f32 %v2823_v4, %v2823_v4  ;;  %1517 = vmatpush.bf16.msra.mxu1 %v2040_v0 }
 0x54f   : > { %1319 = vadd.xlane.f32.xlu1 %v1312_v5  ;;  %1315 = vadd.xlane.f32.xlu2 %v1310_v6 }
 0x5ba   : > { %v1314_v58 = vpop.xlane.xlu2 %1313  ;;  %v1318_v61 = vpop.xlane.xlu0 %1317 }
 0x5bb   : > { %v1321_v63 = vmul.f32 %v1314_v58, %v2803_v54  ;;  %v1323_v2 = vmul.f32 %v1318_v61, %v2803_v54 }
 0x5bd   : > { %v1325_v1 = vadd.f32 1e-06, %v1321_v63  ;;  %v2927_v5 = vadd.f32 1e-06, %v1323_v2 }
 0x5bf   : > { %2359 = vrsqrt.f32 %v1325_v1  ;;  %vm1335_vm5 = vweird.f32 %v1325_v1  ;;  %vm1355_vm12 = vweird.f32 %v2927_v5 }
 0x5c0   : > { %2361 = vrsqrt.f32 %v2927_v5 }
 0x5c2   : > { %v1320_v6 = vpop.xlane.xlu1 %1319  ;;  %v1316_v8 = vpop.xlane.xlu2 %1315 }
 0x5c3   : > { %v1324_v7 = vmul.f32 %v1320_v6, %v2803_v54  ;;  %v1322_v9 = vmul.f32 %v1316_v8, %v2803_v54  ;;  %v2219_v6 = vld [vmem:[%s3125_s12 + $0x18] sm:$0xff]  ;;  %v2217_v8 = vld [vmem:[%s3125_s12 + $0x8] sm:$0xff] }
 0x5c4   : > { %1677 = vmatpush.bf16.msra.mxu2 %v2219_v6 }
 0x5c5   : > { %v1328_v10 = vadd.f32 1e-06, %v1324_v7  ;;  %v2360_v11 = vpop.eup %2359  ;;  %v1326_v12 = vadd.f32 1e-06, %v1322_v9  ;;  %v2227_v7 = vld [vmem:[%s3125_s12 + $0x58] sm:$0xff]  ;;  %v2225_v9 = vld [vmem:[%s3125_s12 + $0x48] sm:$0xff] }
 0x5c6   : > { %v1330_v13 = vmul.f32 %v2360_v11, %v1325_v1  ;;  %v2932_v18 = vpop.eup %2361  ;;  %vm1336_vm4 = vweird.f32 %v2360_v11 }
 0x5c7   : > { %2363 = vrsqrt.f32 %v1328_v10  ;;  %v1350_v54 = vmul.f32 %v2932_v18, %v2927_v5  ;;  %vm1337_vm6 = vmor %vm1335_vm5, %vm1336_vm4  ;;  %vm1345_vm8 = vweird.f32 %v1326_v12  ;;  %vm1365_vm10 = vweird.f32 %v1328_v10 }
 0x5c8   : > { %2365 = vrsqrt.f32 %v1326_v12  ;;  %v1331_v14 = vmul.f32 %v2360_v11, %v1330_v13  ;;  %vm1356_vm13 = vweird.f32 %v2932_v18 }
 0x5c9   : > { %v1351_v29 = vmul.f32 %v2932_v18, %v1350_v54  ;;  %vm1357_vm15 = vmor %vm1355_vm12, %vm1356_vm13 }
 0x5ca   : > { %v1332_v17 = vmul.f32 0.5, %v1331_v14 }
 0x5cb   : > { %v1352_v36 = vmul.f32 0.5, %v1351_v29 }
 0x5cc   : > { %v1333_v15 = vsub.f32 1.5, %v1332_v17 }
 0x5cd   : > { %v2934_v19 = vpop.eup %2363  ;;  %v1353_v48 = vsub.f32 1.5, %v1352_v36 }
 0x5ce   : > { %v2366_v20 = vpop.eup %2365  ;;  %v1360_v21 = vmul.f32 %v2934_v19, %v1328_v10  ;;  %v1334_v16 = vmul.f32 %v2360_v11, %v1333_v15  ;;  %vm1366_vm11 = vweird.f32 %v2934_v19  ;;  %v2216_v10 = vld [vmem:[%s3125_s12] sm:$0xff] }
 0x5cf   : > { %v1340_v22 = vmul.f32 %v2366_v20, %v1326_v12  ;;  %vm1346_vm7 = vweird.f32 %v2366_v20  ;;  %vm1367_vm14 = vmor %vm1365_vm10, %vm1366_vm11  ;;  %v1354_v55 = vmul.f32 %v2932_v18, %v1353_v48  ;;  %v1405_v12 = vld [vmem:[%s3126_s13] sm:$0x3] }
 0x5d0   : > { %v1361_v25 = vmul.f32 %v2934_v19, %v1360_v21  ;;  %v1338_v24 = vsel %vm1337_vm6, %v2360_v11, %v1334_v16  ;;  %vm1347_vm9 = vmor %vm1345_vm8, %vm1346_vm7  ;;  %v2224_v11 = vld [vmem:[%s3125_s12 + $0x40] sm:$0xff]  ;;  %v1407_v17 = vperm.slane %v1405_v12, 0 }
 0x5d1   : > { %v1341_v26 = vmul.f32 %v2366_v20, %v1340_v22  ;;  %v1369_v34 = vmul.f32 %v1338_v24, %v2811_v60  ;;  %v1358_v58 = vsel %vm1357_vm15, %v2932_v18, %v1354_v55  ;;  %v1408_v18 = vperm.slane %v1405_v12, 1 }
 0x5d2   : > { %v1362_v32 = vmul.f32 0.5, %v1361_v25  ;;  %v1371_v62 = vmul.f32 %v1358_v58, %v2808_v59  ;;  %v2218_v59 = vld [vmem:[%s3125_s12 + $0x10] sm:$0xff] }
 0x5d3   : > { %v1342_v23 = vmul.f32 0.5, %v1341_v26  ;;  %v1376_v44 = vmul.f32 %v2354_v35, %v1369_v34  ;;  %1678 = vmatpush.bf16.msra.mxu2 %v2218_v59 }
 0x5d4   : > { %v1363_v40 = vsub.f32 1.5, %v1362_v32  ;;  %v1378_v0 = vmul.f32 %v2354_v35, %v1371_v62 }
 0x5d5   : > { %v1343_v33 = vsub.f32 1.5, %v1342_v23  ;;  %v1383_v52 = vadd.f32 %v2355_v45, %v1376_v44 }
 0x5d6   : > { %v1364_v51 = vmul.f32 %v2934_v19, %v1363_v40  ;;  %v1385_v2 = vadd.f32 %v2355_v45, %v1378_v0 }
 0x5d7   : > { %v1344_v37 = vmul.f32 %v2366_v20, %v1343_v33  ;;  %1679 = vmatpush.bf16.msra.mxu2 %v2217_v8 }
 0x5d8   : > { %v1368_v57 = vsel %vm1367_vm14, %v2934_v19, %v1364_v51 }
 0x5d9   : > { %v1348_v60 = vsel %vm1347_vm9, %v2366_v20, %v1344_v37  ;;  %v1372_v61 = vmul.f32 %v1368_v57, %v2820_v3  ;;  %v2226_v3 = vld [vmem:[%s3125_s12 + $0x50] sm:$0xff] }
 0x5da   : > { %v1370_v42 = vmul.f32 %v1348_v60, %v2823_v4  ;;  %v2228_v4 = vld [vmem:[%s3125_s12 + $0x60] sm:$0xff] }
 0x5db   : > { %1695 = vmatpush.bf16.msra.mxu3 %v2228_v4  ;;  %v1379_v63 = vmul.f32 %v2354_v35, %v1372_v61  ;;  %1680 = vmatpush.bf16.msra.mxu2 %v2216_v10 }
 0x5dc   : > { %v1377_v49 = vmul.f32 %v2354_v35, %v1370_v42  ;;  %v2356_v42 = vld [vmem:[%s3127_s16] ss:$0 sm:$0xff] }
 0x5dd   : > { %v1386_v1 = vadd.f32 %v2355_v45, %v1379_v63 }
 0x5de   : > { %v1384_v53 = vadd.f32 %v2355_v45, %v1377_v49 }
 0x5df   : > { %v1388_v5 = vpack.c.bf16 %v1386_v1, %v1385_v2  ;;  %1696 = vmatpush.bf16.msra.mxu3 %v2227_v7 }
 0x5e0   : > { %v1387_v56 = vpack.c.bf16 %v1384_v53, %v1383_v52 }
 0x5e2   : > { %1499 = vmatmul.bf16.vlgmr.msra.gmra.mxu0 %v1387_v56  ;;  %1518 = vmatmul.bf16.vlgmr.msra.gmra.mxu1 %v1387_v56 }
 0x5e3   : > { %1697 = vmatpush.bf16.msra.mxu3 %v2226_v3 }
 0x5e7   : > { %1698 = vmatpush.bf16.msra.mxu3 %v2225_v9 }
 0x5eb   : > { %1699 = vmatpush.bf16.msra.mxu3 %v2224_v11 }
 0x5f2   : > { %1504 = vmatmul.bf16.gmra.mxu0 %v1388_v5  ;;  %1523 = vmatmul.bf16.gmra.mxu1 %v1388_v5 }
 0x65f   : > { %v1500_v13 = vpop.f32.mrf.mxu0  ;;  %v1519_v14 = vpop.f32.mrf.mxu1 }
 0x660   : > { %v1501_v19 = vadd.f32 %v1500_v13, %v1407_v17  ;;  %v1520_v15 = vadd.f32 %v1519_v14, %v1408_v18 }
 0x662   : > { %v1529_v22 = vmax.f32 %v1501_v19, 0.0  ;;  %v1530_v25 = vmax.f32 %v1520_v15, 0.0 }
 0x667   : > { %v1502_v20 = vpop.f32.mrf.mxu0  ;;  %v1521_v21 = vpop.f32.mrf.mxu1 }
 0x668   : > { %v1503_v16 = vadd.f32 %v1502_v20, %v1407_v17  ;;  %v1522_v54 = vadd.f32 %v1521_v21, %v1408_v18 }
 0x66a   : > { %v1531_v26 = vmax.f32 %v1503_v16, 0.0  ;;  %v1532_v27 = vmax.f32 %v1522_v54, 0.0 }
 0x66c   : > { %v1537_v28 = vpack.c.bf16 %v1531_v26, %v1529_v22  ;;  %v1538_v29 = vpack.c.bf16 %v1532_v27, %v1530_v25 }
 0x66e   : > { %1681 = vmatmul.bf16.vlgmr.msra.gmra.mxu2 %v1537_v28  ;;  %1700 = vmatmul.bf16.vlgmr.msra.gmra.mxu3 %v1538_v29 }
 0x66f   : > { %v1505_v23 = vpop.f32.mrf.mxu0  ;;  %v1524_v24 = vpop.f32.mrf.mxu1 }
 0x670   : > { %v1506_v30 = vadd.f32 %v1505_v23, %v1407_v17  ;;  %v1525_v31 = vadd.f32 %v1524_v24, %v1408_v18 }
 0x672   : > { %v1533_v36 = vmax.f32 %v1506_v30, 0.0  ;;  %v1534_v37 = vmax.f32 %v1525_v31, 0.0 }
 0x677   : > { %v1507_v32 = vpop.f32.mrf.mxu0  ;;  %v1526_v33 = vpop.f32.mrf.mxu1 }
 0x678   : > { %v1508_v34 = vadd.f32 %v1507_v32, %v1407_v17  ;;  %v1527_v35 = vadd.f32 %v1526_v33, %v1408_v18 }
 0x67a   : > { %v1535_v38 = vmax.f32 %v1508_v34, 0.0  ;;  %v1536_v39 = vmax.f32 %v1527_v35, 0.0 }
 0x67c   : > { %v1539_v40 = vpack.c.bf16 %v1535_v38, %v1533_v36  ;;  %v1540_v60 = vpack.c.bf16 %v1536_v39, %v1534_v37 }
 0x67e   : > { %1686 = vmatmul.bf16.gmra.mxu2 %v1539_v40  ;;  %1705 = vmatmul.bf16.gmra.mxu3 %v1540_v60 }
 0x6f1   : > { %v1682_v44 = vpop.f32.mrf.mxu2  ;;  %v1701_v45 = vpop.f32.mrf.mxu3 }
 0x6f2   : > { %v1683_v48 = vadd.f32 %v2356_v42, %v1682_v44 }
 0x6f4   : > { %v1702_v49 = vadd.f32 %v1701_v45, %v1683_v48 }
 0x6f6   : > { %v1711_v50 = vadd.f32 %v1702_v49, %v2793_v43 }
 0x6f8   : > { %1715 = vst [vmem:[%s2675_s21] sm:$0xff] %v1711_v50 }
 0x6f9   : > { %v1684_v4 = vpop.f32.mrf.mxu2  ;;  %v1703_v51 = vpop.f32.mrf.mxu3 }
 0x6fa   : > { %v1685_v52 = vadd.f32 %v2356_v42, %v1684_v4 }
 0x6fc   : > { %v1704_v53 = vadd.f32 %v1703_v51, %v1685_v52 }
 0x6fe   : > { %v1712_v55 = vadd.f32 %v1704_v53, %v2799_v47 }
 0x700   : > { %1716 = vst [vmem:[%s2675_s21 + $0x8] sm:$0xff] %v1712_v55 }
 0x701   : > { %v1687_v56 = vpop.f32.mrf.mxu2  ;;  %v1706_v57 = vpop.f32.mrf.mxu3 }
 0x702   : > { %v1688_v58 = vadd.f32 %v2356_v42, %v1687_v56 }
 0x704   : > { %v1707_v61 = vadd.f32 %v1706_v57, %v1688_v58 }
 0x706   : > { %v1713_v62 = vadd.f32 %v1707_v61, %v2791_v41 }
 0x708   : > { %1717 = vst [vmem:[%s2675_s21 + $0x10] sm:$0xff] %v1713_v62 }
 0x709   : > { %v1689_v63 = vpop.f32.mrf.mxu2  ;;  %v1708_v1 = vpop.f32.mrf.mxu3 }
 0x70a   : > { %v1690_v0 = vadd.f32 %v2356_v42, %v1689_v63 }
 0x70c   : > { %v1709_v43 = vadd.f32 %v1708_v1, %v1690_v0 }
 0x70e   : > { %v1714_v2 = vadd.f32 %v1709_v43, %v2797_v46 }
 0x710   : > { %1718 = vst [vmem:[%s2675_s21 + $0x18] sm:$0xff] %v1714_v2 }
 0x711 PF: > { %s3128_s25 = sld [smem:[#allocation11_spill]]  ;;  %s1732_s23 = sshll.u32 %s2675_s21, 4  ;;  %s1733_s23 = int_to_ptr.vmem [resolvable:$true] %s1732_s23 }
 0x712   : > { %s3129_s26 = sld [smem:[#allocation9_spill]] }
 0x713   : > { %s3131_s29 = sld [smem:[#allocation27_spill]] }
 0x717   : > { %s2232_s30 = sshll.u32 %s3128_s25, 5 }
 0x718   : > { %s3132_s28 = sand.u32 1, %s3129_s26  }
 0x719   : > { %s1731_s1 = scalar_lea.hbm %s3131_s29, %s2232_s30  ;;  %s1720_s24 = scalar_lea.sflag [#allocation6], %s3132_s28 }
 0x71a   : > { %s1734_s19 = sshll.u32 %s1731_s1, 4  ;;  %s2387_s15 = scalar_lea.hbm %s3131_s29, 64  ;;  %s1735_s19 = int_to_ptr.hbm [resolvable:$true] %s1734_s19 }
 0x71b   : > { %s2381_s0 = sshra.s32 %s1735_s19, 4  ;;  %s2382_s0 = int_to_ptr.hbm [resolvable:$true] %s2381_s0 }
 0x71c   : > { %s2383_s22 = scalar_lea.hbm %s2382_s0, 32  ;;  %p2388_p6 = scmp.lt.s32.totalorder %s2382_s0, %s3131_s29 }
 0x71d   : > { %p2384_p2 = scmp.ne.s32.totalorder %s2382_s0, %s2383_s22  ;;  %p2389_p7 = scmp.lt.s32.totalorder %s2387_s15, %s2383_s22 }
 0x71f   : > { %p2385_p4 = pnand %p2384_p2, %p2602_p3  ;;  %p2390_p8 = por %p2389_p7, %p2388_p6 }
 0x721   : > { %p2386_p5 = pneg %p2385_p4 }
 0x723   : > { %p2391_p10 = pnand %p2390_p8, %p2386_p5 }
 0x725   : > { %2394 = shalt.err (!%p2391_p10)
}
 0x726   : > { %s2466_s21 = smov 128   ;;  %s2467_s25 = smov 8  }
 0x727   : > { %2246 = dma.vmem_to_hbm [thread:$0]  (%p2602_p3), %s1733_s23, 512, %s1735_s19, %s1720_s24, %s2466_s21, %s2466_s21, %s2467_s25  }
 0x728 PF: > { %s3133_s26 = sld [smem:[#allocation14_spill]] }
 0x729   : > { %s3134_s30 = sld [smem:[#allocation8_spill]] }
 0x72e   : > { %p2252_p11 = scmp.ge.s32.totalorder %s3133_s26, 2 }
 0x72f   : > { %s1749_s17 = sand.u32 1, %s3134_s30  }
 0x730   : > { %p2249_p12 = pnand %p2252_p11, %p2612_p9  ;;  %s1750_s1 = scalar_lea.sflag [#allocation6], %s1749_s17 }
 0x732   : > { %p2250_p13 = pneg %p2249_p12 }
 0x734   : > { %2428 = dma.done.wait (%p2250_p13), %s1750_s1, 512  }
 0x735   : > { %2430 = vsyncadd (%p2250_p13), %s1750_s1, 4294966784  ;;  %s29_s28 = sadd.s32 1, %s3133_s26   ;;  %s3136_s21 = sld [smem:[#allocation9_spill]] }
 0x736   : > { %p26_p0 = scmp.ge.s32.totalorder %s29_s28, 10   ;;  %s3137_s22 = sld [smem:[#allocation10_spill]] }
 0x737   : > { %s3138_s23 = sld [smem:[#allocation19_spill]] }
 0x738   : > { %s3139_s24 = sld [smem:[#allocation12_spill]]  ;;  %28 = sbr.rel (!%p26_p0) target bundleno = 14 (0xe), region = 151 }
 0x739   : > { %s3140_s25 = sld [smem:[#allocation13_spill]] }
 0x73a   : > { %s3141_s26 = sld [smem:[#allocation15_spill]] }
 0x73b   : > { %s3142_s27 = sld [smem:[#allocation17_spill]] }
 0x73d   :  { %1756 = vsyncpa [#allocation6], 1 }
 0x73e   :  { %1758 = vsyncpa [#allocation6 + $0x1], 1 }

</bundles_post_ra>
